<compile_context>
chip_gen: v6e
topology: v6e:2x2x1
jax: 0.10.0
libtpu: 0.0.40
codegen_flags: <defaults>
</compile_context>

<pallas_src>
import functools

import jax
import jax.numpy as jnp
from jax.experimental import pallas as pl
from jax.experimental.pallas import tpu as pltpu


# ---------------------------------------------------------------------------
# Kernel
# ---------------------------------------------------------------------------
def _dmpnn_kernel(xe_ref, w1_ref, w2_ref, wm_ref, tail_ref, out_ref, *,
                  N, Dn, De, H, row_bfc, row_bout):
    """One grid step processes Bt whole graphs with lane-dense intermediates."""
    Bt = xe_ref.shape[0]
    NH = N * H
    c_adj = Dn + N * De                       # adjacency columns inside xe

    xe = xe_ref[...]                          # (Bt, N, K1)
    rows = xe.reshape(Bt * N, xe.shape[-1])   # free: leading-dim merge

    # ---- stage 1: one MXU matmul produces, lane-dense per node-row:
    #   cols [0:NH]      = x_exp@W_in_x + edge@W_in_e   (pre-activation of h)
    #   cols [NH:2NH]    = adjacency value replicated H-wide (mask)
    #   cols [2NH:2NH+H] = x@W_out_x                    (readout x-term)
    s1 = jnp.dot(rows, w1_ref[...], preferred_element_type=jnp.float32)
    pre = s1[:, 0:NH]
    adj_dense = s1[:, NH:2 * NH]
    xo_rows = s1[:, 2 * NH:2 * NH + H]

    h0 = jnp.maximum(pre * adj_dense, 0.0)                        # (Bt*N, NH)

    # ---- stage 2 (single message-passing step; the module hard-codes 1):
    #   [P | Sw] = h0 @ [blockdiag(W_h) | rowtile(W_h)]  (one fused matmul)
    #   P [(g,i), j*H+:] = h0[g,i,j,:] @ W_h
    #   Sw[(g,i), :]     = (sum_j h0[g,i,j,:]) @ W_h  = W_h(s_i)
    ps = jnp.dot(h0, w2_ref[...], preferred_element_type=jnp.float32)
    P = ps[:, 0:NH]
    ps3 = ps.reshape(Bt, N, NH + H)           # free: leading-dim split
    sw = ps3[:, :, NH:NH + H]                 # (Bt, N, H)  Sw of each node
    # The message at (i, j) uses Sw of the *source* node j: place node j's Sw
    # at lane segment j (small static lane-concat) and broadcast over rows i.
    sw_lane = jnp.concatenate([sw[:, j:j + 1, :] for j in range(N)],
                              axis=-1)        # (Bt, 1, N*H)

    h0_3 = h0.reshape(Bt, N, NH)
    h1 = (jnp.maximum(h0_3 + (sw_lane - P.reshape(Bt, N, NH)), 0.0)
          * adj_dense.reshape(Bt, N, NH))     # (Bt, N, NH)

    # ---- readout: Mo = (sum_j h1[g,i,j,:]) @ W_out_m via a row-tiled weight
    mo_rows = jnp.dot(h1.reshape(Bt * N, NH), wm_ref[...],
                      preferred_element_type=jnp.float32)         # (Bt*N, H)
    b_out = tail_ref[row_bout:row_bout + 1, 0:H]                  # (1, H)
    z = xo_rows + mo_rows + b_out

    deg = jnp.sum(xe[:, :, c_adj:c_adj + N].reshape(Bt * N, N),
                  axis=-1, keepdims=True)                         # (Bt*N, 1)
    hn = jnp.maximum(z, 0.0) * (deg > 0.0).astype(jnp.float32)    # node mask

    # ---- pool over nodes + final fc (O padded to 128 lanes -> dense store)
    hv = jnp.sum(hn.reshape(Bt, N, H), axis=1)                    # (Bt, H)
    w_fc = tail_ref[0:H, :]                                       # (H, 128)
    b_fc = tail_ref[row_bfc:row_bfc + 1, :]                       # (1, 128)
    out_ref[0] = jnp.dot(hv, w_fc, preferred_element_type=jnp.float32) + b_fc


# ---------------------------------------------------------------------------
# Hardware-aware sizing helpers
# ---------------------------------------------------------------------------
def _rup(v, m):
    return ((v + m - 1) // m) * m


def _vmem_capacity_bytes():
    try:
        cap = int(pltpu.get_tpu_info().vmem_capacity_bytes)
    except Exception:  # non-TPU trace env / older jax
        cap = 64 * 1024 * 1024          # v7x-sized conservative default
    return max(cap, 32 * 1024 * 1024)


def _num_tensorcores():
    """TensorCores per chip (1 on v5e/v6e, 2 on v7x); conservative fallback 1."""
    probes = []
    try:
        probes.append(pltpu.get_tpu_info())
    except Exception:
        pass
    try:
        probes.append(jax.devices()[0])
    except Exception:
        pass
    for obj in probes:
        for attr in ("num_cores", "core_count", "num_tensorcores",
                     "tensorcore_count"):
            v = getattr(obj, attr, None)
            if isinstance(v, int) and v > 0:
                return max(1, min(int(v), 2))
    return 1


def _per_graph_vmem_bytes(N, K1, C1, NH, H):
    """Per-graph VMEM with lane/sublane padding and input double-buffering."""
    f = 4
    rows = _rup(N, 8)
    xe_blk = rows * _rup(K1, 128) * f * 2        # fused input, 2 buffers
    s1 = rows * _rup(C1, 128) * f                # stage-1 result
    ps = rows * _rup(NH + H, 128) * f            # stage-2 result
    big = rows * _rup(NH, 128) * f               # one (N, N*H) intermediate
    small = rows * _rup(H, 128) * f              # xo / mo / z / hn sized temps
    return xe_blk + s1 + ps + 4 * big + 4 * small


def _fixed_vmem_bytes(K1, C1, NH, H, tail_rows, opad):
    """Weight slabs (double buffered) + output block, lane/sublane padded."""
    f = 4
    w = (_rup(K1, 8) * _rup(C1, 128) + _rup(NH, 8) * _rup(NH + H, 128)
         + _rup(NH, 8) * _rup(H, 128) + _rup(tail_rows, 8) * opad)
    return 2 * f * w + 2 * 8 * opad * f


def _choose_block_batch(B, per_graph_bytes, fixed_bytes, budget_bytes, num_tc):
    """Largest graphs-per-step (dividing B) that fits the padded VMEM model,
    with the grid-step count an exact multiple of the TensorCore count when
    possible (even split on v7x, single maximal block on 1-TC chips)."""
    avail = max(budget_bytes - fixed_bytes, per_graph_bytes)
    bt_cap = max(1, min(B, avail // per_graph_bytes))
    divisors = [d for d in range(B, 0, -1) if B % d == 0]
    for bt in divisors:
        if bt <= bt_cap and (B // bt) % num_tc == 0:
            return bt
    for bt in divisors:
        if bt <= bt_cap:
            return bt
    return 1


# ---------------------------------------------------------------------------
# Weight packing (pure layout plumbing, done once in the wrapper)
# ---------------------------------------------------------------------------
def _prepare_weights(p, N):
    Dn, H = p["w_in_x"].shape
    De = p["w_in_e"].shape[0]
    O = p["w_fc"].shape[1]
    NH = N * H
    eye = jnp.eye(N, dtype=jnp.float32)

    # stage-1 weight: rows [x_i | edge row | adj row | whole-graph x],
    #                 cols [pre-activation | adj_dense | x@W_out_x]
    K1 = Dn + N * De + N + N * Dn
    C1 = 2 * NH + H
    w1 = jnp.zeros((K1, C1), jnp.float32)
    r = 0
    w1 = w1.at[r:r + Dn, 2 * NH:2 * NH + H].set(p["w_out_x"]); r += Dn
    w1 = w1.at[r:r + N * De, 0:NH].set(jnp.kron(eye, p["w_in_e"])); r += N * De
    w1 = w1.at[r:r + N, NH:2 * NH].set(
        jnp.kron(eye, jnp.ones((1, H), jnp.float32))); r += N
    w1 = w1.at[r:r + N * Dn, 0:NH].set(jnp.kron(eye, p["w_in_x"]))

    # stage-2 weight: [blockdiag(W_h) | row-tiled W_h]
    w2 = jnp.concatenate(
        [jnp.kron(eye, p["w_h"]), jnp.tile(p["w_h"], (N, 1))], axis=1)

    # readout weight: row-tiled W_out_m (computes sum_j h1 @ W_out_m directly)
    wm = jnp.tile(p["w_out_m"], (N, 1))

    # small tail slab (128 lanes wide): [w_fc padded ; b_fc ; b_out]
    OPAD = 128
    row_bfc = _rup(H, 8)
    row_bout = row_bfc + 8
    tail = jnp.zeros((row_bout + 8, OPAD), jnp.float32)
    tail = tail.at[0:H, 0:O].set(p["w_fc"])
    tail = tail.at[row_bfc:row_bfc + 1, 0:O].set(p["b_fc"])
    tail = tail.at[row_bout:row_bout + 1, 0:H].set(p["b_out"])

    meta = dict(K1=K1, C1=C1, OPAD=OPAD, row_bfc=row_bfc, row_bout=row_bout)
    return w1, w2, wm, tail, meta


# ---------------------------------------------------------------------------
# Wrapper
# ---------------------------------------------------------------------------
def dmpnn_forward(x, edge, adj, params):
    B, N, Dn = x.shape
    De = edge.shape[-1]
    H = params["w_h"].shape[0]
    O = params["w_fc"].shape[1]
    NH = N * H

    w1, w2, wm, tail, meta = _prepare_weights(params, N)
    K1, C1, OPAD = meta["K1"], meta["C1"], meta["OPAD"]

    # Fused, matmul-ready per-node input row (metadata reshapes + one concat):
    #   [x_i | edge row (j-major, lane-dense) | adj row | whole-graph x]
    xe = jnp.concatenate(
        [x,
         edge.reshape(B, N, N * De),
         adj,
         jnp.broadcast_to(x.reshape(B, 1, N * Dn), (B, N, N * Dn))],
        axis=-1)                                  # (B, N, K1)

    cap = _vmem_capacity_bytes()
    num_tc = _num_tensorcores()
    per_graph = _per_graph_vmem_bytes(N, K1, C1, NH, H)
    fixed = _fixed_vmem_bytes(K1, C1, NH, H, tail.shape[0], OPAD)
    Bt = _choose_block_batch(B, per_graph, fixed, cap * 3 // 8, num_tc)
    nb = B // Bt
    vmem_limit = int(min(max(fixed + 2 * Bt * per_graph, 32 * 2 ** 20),
                         cap * 3 // 4))

    kernel = functools.partial(_dmpnn_kernel, N=N, Dn=Dn, De=De, H=H,
                               row_bfc=meta["row_bfc"],
                               row_bout=meta["row_bout"])

    out = pl.pallas_call(
        kernel,
        out_shape=jax.ShapeDtypeStruct((nb, Bt, OPAD), jnp.float32),
        grid=(nb,),
        in_specs=[
            pl.BlockSpec((Bt, N, K1), lambda b: (b, 0, 0)),     # fused data
            pl.BlockSpec((K1, C1), lambda b: (0, 0)),           # stage-1 W
            pl.BlockSpec((NH, NH + H), lambda b: (0, 0)),       # stage-2 W
            pl.BlockSpec((NH, H), lambda b: (0, 0)),            # readout W
            pl.BlockSpec((tail.shape[0], OPAD), lambda b: (0, 0)),  # tail slab
        ],
        out_specs=pl.BlockSpec((1, Bt, OPAD), lambda b: (b, 0, 0)),
        compiler_params=pltpu.CompilerParams(
            dimension_semantics=("parallel",),
            vmem_limit_bytes=vmem_limit),
    )(xe, w1, w2, wm, tail)

    return out.reshape(B, OPAD)[:, :O]


# ---------------------------------------------------------------------------
# Pure-JAX reference (f32, HIGHEST-precision dots) and synthetic params
# ---------------------------------------------------------------------------
def dmpnn_reference(x, edge, adj, p):
    hp = jax.lax.Precision.HIGHEST
    B, N, Dn = x.shape
    x_exp = jnp.broadcast_to(x[:, None, :, :], (B, N, N, Dn))
    h = (jnp.einsum("bijk,kh->bijh", x_exp, p["w_in_x"], precision=hp)
         + jnp.einsum("bijk,kh->bijh", edge, p["w_in_e"], precision=hp)
         ) * adj[..., None]
    h0 = jax.nn.relu(h)
    s = jnp.sum(h0, axis=2)
    m = s[:, None, :, :] - h0
    h1 = jax.nn.relu(
        h0 + jnp.einsum("bijh,hg->bijg", m, p["w_h"], precision=hp)
    ) * adj[..., None]
    M = jnp.sum(h1, axis=2)
    mask = (jnp.sum(adj, axis=2) > 0).astype(jnp.float32)[..., None]
    hn = jax.nn.relu(
        (jnp.einsum("bnk,kh->bnh", x, p["w_out_x"], precision=hp)
         + jnp.einsum("bnk,kh->bnh", M, p["w_out_m"], precision=hp)
         + p["b_out"]) * mask)
    hv = jnp.sum(hn, axis=1)
    return jnp.dot(hv, p["w_fc"], precision=hp) + p["b_fc"]


def init_params(key, node_dim, edge_dim, hidden_dim, output_dim):
    """Deterministic synthetic parameters (uniform ~ torch Linear default),
    stored in (in_features, out_features) layout."""
    ks = jax.random.split(key, 8)

    def u(k, shape, fan_in):
        bound = 1.0 / jnp.sqrt(jnp.float32(fan_in))
        return jax.random.uniform(k, shape, jnp.float32, -bound, bound)

    return {
        "w_in_x":  u(ks[0], (node_dim, hidden_dim), node_dim + edge_dim),
        "w_in_e":  u(ks[1], (edge_dim, hidden_dim), node_dim + edge_dim),
        "w_h":     u(ks[2], (hidden_dim, hidden_dim), hidden_dim),
        "w_out_x": u(ks[3], (node_dim, hidden_dim), node_dim + hidden_dim),
        "w_out_m": u(ks[4], (hidden_dim, hidden_dim), node_dim + hidden_dim),
        "b_out":   u(ks[5], (1, hidden_dim), node_dim + hidden_dim),
        "w_fc":    u(ks[6], (hidden_dim, output_dim), hidden_dim),
        "b_fc":    u(ks[7], (1, output_dim), hidden_dim),
    }


if __name__ == "__main__":
    B, N = 8, 8
    node_dim, edge_dim, hidden_dim, output_dim = 8, 4, 32, 8

    key = jax.random.PRNGKey(0)
    kx, ke, ka, kp = jax.random.split(key, 4)

    x = jax.random.normal(kx, (B, N, node_dim), jnp.float32)
    edge = jax.random.normal(ke, (B, N, N, edge_dim), jnp.float32)
    adj = (jax.random.uniform(ka, (B, N, N)) > 0.5).astype(jnp.float32)
    # leave one node fully disconnected to exercise the node mask
    adj = adj.at[1, N - 1, :].set(0.0).at[1, :, N - 1].set(0.0)

    params = init_params(kp, node_dim, edge_dim, hidden_dim, output_dim)

    out = jax.block_until_ready(dmpnn_forward(x, edge, adj, params))
    ref = dmpnn_reference(x, edge, adj, params)

    assert out.shape == (B, output_dim)
    # all-f32 kernel (MXU f32 accumulation); only reassociation-level error
    assert jnp.allclose(out, ref, rtol=1e-4, atol=1e-4), (out, ref)

    # TODO(synk): layer_size is hard-coded to 1 by the PyTorch module itself;
    # layer_size > 1 would need a small in-kernel loop over the stage-2 step.
    print("KERNEL_OK")
</pallas_src>

<mosaic_0001>
module attributes {stable_mosaic.version = 11 : i64} {
  func.func @_dmpnn_kernel(%arg0: i32, %arg1: memref<8x8x112xf32, #tpu.memory_space<vmem>>, %arg2: memref<112x544xf32, #tpu.memory_space<vmem>>, %arg3: memref<256x288xf32, #tpu.memory_space<vmem>>, %arg4: memref<256x32xf32, #tpu.memory_space<vmem>>, %arg5: memref<48x128xf32, #tpu.memory_space<vmem>>, %arg6: memref<1x8x128xf32, #tpu.memory_space<vmem>>) attributes {dimension_semantics = [#tpu.dimension_semantics<parallel>], iteration_bounds = array<i64: 1>, scalar_prefetch = 0 : i64, scratch_operands = 0 : i64, tpu.core_type = #tpu.core_type<tc>, window_params = [{transform_indices = @transform_0, window_bounds = array<i64: 8, 8, 112>}, {pipeline_mode = #tpu.pipeline_mode<synchronous>, transform_indices = @transform_1, window_bounds = array<i64: 112, 544>}, {pipeline_mode = #tpu.pipeline_mode<synchronous>, transform_indices = @transform_2, window_bounds = array<i64: 256, 288>}, {pipeline_mode = #tpu.pipeline_mode<synchronous>, transform_indices = @transform_3, window_bounds = array<i64: 256, 32>}, {pipeline_mode = #tpu.pipeline_mode<synchronous>, transform_indices = @transform_4, window_bounds = array<i64: 48, 128>}, {transform_indices = @transform_5, window_bounds = array<i64: 1, 8, 128>}]} {
    %c0 = arith.constant 0 : index
    %c0_0 = arith.constant 0 : index
    %c0_1 = arith.constant 0 : index
    %0 = vector.load %arg1[%c0, %c0_0, %c0_1] : memref<8x8x112xf32, #tpu.memory_space<vmem>>, vector<8x8x112xf32>
    %1 = vector.shape_cast %0 : vector<8x8x112xf32> to vector<64x112xf32>
    %c0_2 = arith.constant 0 : index
    %c0_3 = arith.constant 0 : index
    %2 = vector.load %arg2[%c0_2, %c0_3] : memref<112x544xf32, #tpu.memory_space<vmem>>, vector<112x544xf32>
    %cst = arith.constant dense<0.000000e+00> : vector<64x544xf32>
    %3 = tpu.matmul %1, %2, %cst {dimension_numbers = #tpu.dot_dimension_numbers<[1], [0], [0], [1], [0, 0, 1, 1], [], []>} : vector<64x112xf32>, vector<112x544xf32>, vector<64x544xf32> -> vector<64x544xf32>
    %4 = vector.extract_strided_slice %3 {offsets = [0, 0], sizes = [64, 256], strides = [1, 1]} : vector<64x544xf32> to vector<64x256xf32>
    %5 = vector.extract_strided_slice %3 {offsets = [0, 256], sizes = [64, 256], strides = [1, 1]} : vector<64x544xf32> to vector<64x256xf32>
    %6 = vector.extract_strided_slice %3 {offsets = [0, 512], sizes = [64, 32], strides = [1, 1]} : vector<64x544xf32> to vector<64x32xf32>
    %7 = arith.mulf %4, %5 : vector<64x256xf32>
    %cst_4 = arith.constant 0.000000e+00 : f32
    %8 = vector.broadcast %cst_4 : f32 to vector<64x256xf32>
    %9 = arith.maximumf %7, %8 : vector<64x256xf32>
    %c0_5 = arith.constant 0 : index
    %c0_6 = arith.constant 0 : index
    %10 = vector.load %arg3[%c0_5, %c0_6] : memref<256x288xf32, #tpu.memory_space<vmem>>, vector<256x288xf32>
    %cst_7 = arith.constant dense<0.000000e+00> : vector<64x288xf32>
    %11 = tpu.matmul %9, %10, %cst_7 {dimension_numbers = #tpu.dot_dimension_numbers<[1], [0], [0], [1], [0, 0, 1, 1], [], []>} : vector<64x256xf32>, vector<256x288xf32>, vector<64x288xf32> -> vector<64x288xf32>
    %12 = vector.extract_strided_slice %11 {offsets = [0, 0], sizes = [64, 256], strides = [1, 1]} : vector<64x288xf32> to vector<64x256xf32>
    %13 = vector.shape_cast %11 : vector<64x288xf32> to vector<8x8x288xf32>
    %14 = vector.extract_strided_slice %13 {offsets = [0, 0, 256], sizes = [8, 8, 32], strides = [1, 1, 1]} : vector<8x8x288xf32> to vector<8x8x32xf32>
    %15 = vector.extract_strided_slice %14 {offsets = [0, 0, 0], sizes = [8, 1, 32], strides = [1, 1, 1]} : vector<8x8x32xf32> to vector<8x1x32xf32>
    %16 = vector.extract_strided_slice %14 {offsets = [0, 1, 0], sizes = [8, 1, 32], strides = [1, 1, 1]} : vector<8x8x32xf32> to vector<8x1x32xf32>
    %17 = vector.extract_strided_slice %14 {offsets = [0, 2, 0], sizes = [8, 1, 32], strides = [1, 1, 1]} : vector<8x8x32xf32> to vector<8x1x32xf32>
    %18 = vector.extract_strided_slice %14 {offsets = [0, 3, 0], sizes = [8, 1, 32], strides = [1, 1, 1]} : vector<8x8x32xf32> to vector<8x1x32xf32>
    %19 = vector.extract_strided_slice %14 {offsets = [0, 4, 0], sizes = [8, 1, 32], strides = [1, 1, 1]} : vector<8x8x32xf32> to vector<8x1x32xf32>
    %20 = vector.extract_strided_slice %14 {offsets = [0, 5, 0], sizes = [8, 1, 32], strides = [1, 1, 1]} : vector<8x8x32xf32> to vector<8x1x32xf32>
    %21 = vector.extract_strided_slice %14 {offsets = [0, 6, 0], sizes = [8, 1, 32], strides = [1, 1, 1]} : vector<8x8x32xf32> to vector<8x1x32xf32>
    %22 = vector.extract_strided_slice %14 {offsets = [0, 7, 0], sizes = [8, 1, 32], strides = [1, 1, 1]} : vector<8x8x32xf32> to vector<8x1x32xf32>
    %23 = tpu.concatenate %15, %16, %17, %18, %19, %20, %21, %22 in 2 : vector<8x1x32xf32>, vector<8x1x32xf32>, vector<8x1x32xf32>, vector<8x1x32xf32>, vector<8x1x32xf32>, vector<8x1x32xf32>, vector<8x1x32xf32>, vector<8x1x32xf32> -> vector<8x1x256xf32>
    %24 = vector.shape_cast %9 : vector<64x256xf32> to vector<8x8x256xf32>
    %25 = vector.shape_cast %12 : vector<64x256xf32> to vector<8x8x256xf32>
    %26 = vector.broadcast %23 : vector<8x1x256xf32> to vector<8x8x256xf32>
    %27 = arith.subf %26, %25 : vector<8x8x256xf32>
    %28 = arith.addf %24, %27 : vector<8x8x256xf32>
    %cst_8 = arith.constant 0.000000e+00 : f32
    %29 = vector.broadcast %cst_8 : f32 to vector<8x8x256xf32>
    %30 = arith.maximumf %28, %29 : vector<8x8x256xf32>
    %31 = vector.shape_cast %5 : vector<64x256xf32> to vector<8x8x256xf32>
    %32 = arith.mulf %30, %31 : vector<8x8x256xf32>
    %33 = vector.shape_cast %32 : vector<8x8x256xf32> to vector<64x256xf32>
    %c0_9 = arith.constant 0 : index
    %c0_10 = arith.constant 0 : index
    %34 = vector.load %arg4[%c0_9, %c0_10] : memref<256x32xf32, #tpu.memory_space<vmem>>, vector<256x32xf32>
    %cst_11 = arith.constant dense<0.000000e+00> : vector<64x32xf32>
    %35 = tpu.matmul %33, %34, %cst_11 {dimension_numbers = #tpu.dot_dimension_numbers<[1], [0], [0], [1], [0, 0, 1, 1], [], []>} : vector<64x256xf32>, vector<256x32xf32>, vector<64x32xf32> -> vector<64x32xf32>
    %c40 = arith.constant 40 : index
    %c0_12 = arith.constant 0 : index
    %36 = vector.load %arg5[%c40, %c0_12] : memref<48x128xf32, #tpu.memory_space<vmem>>, vector<1x32xf32>
    %37 = arith.addf %6, %35 : vector<64x32xf32>
    %38 = vector.broadcast %36 : vector<1x32xf32> to vector<64x32xf32>
    %39 = arith.addf %37, %38 : vector<64x32xf32>
    %40 = vector.extract_strided_slice %0 {offsets = [0, 0, 40], sizes = [8, 8, 8], strides = [1, 1, 1]} : vector<8x8x112xf32> to vector<8x8x8xf32>
    %41 = vector.shape_cast %40 : vector<8x8x8xf32> to vector<64x8xf32>
    %cst_13 = arith.constant dense<0.000000e+00> : vector<64xf32>
    %42 = vector.multi_reduction <add>, %41, %cst_13 [1] : vector<64x8xf32> to vector<64xf32>
    %43 = vector.shape_cast %42 : vector<64xf32> to vector<64x1xf32>
    %cst_14 = arith.constant 0.000000e+00 : f32
    %44 = vector.broadcast %cst_14 : f32 to vector<64x32xf32>
    %45 = arith.maximumf %39, %44 : vector<64x32xf32>
    %cst_15 = arith.constant 0.000000e+00 : f32
    %46 = vector.broadcast %cst_15 : f32 to vector<64x1xf32>
    %47 = arith.cmpf ogt, %43, %46 : vector<64x1xf32>
    %48 = arith.extui %47 : vector<64x1xi1> to vector<64x1xi32>
    %49 = arith.sitofp %48 : vector<64x1xi32> to vector<64x1xf32>
    %50 = vector.broadcast %49 : vector<64x1xf32> to vector<64x32xf32>
    %51 = arith.mulf %45, %50 : vector<64x32xf32>
    %52 = vector.shape_cast %51 : vector<64x32xf32> to vector<8x8x32xf32>
    %cst_16 = arith.constant dense<0.000000e+00> : vector<8x32xf32>
    %53 = vector.multi_reduction <add>, %52, %cst_16 [1] : vector<8x8x32xf32> to vector<8x32xf32>
    %c0_17 = arith.constant 0 : index
    %c0_18 = arith.constant 0 : index
    %54 = vector.load %arg5[%c0_17, %c0_18] : memref<48x128xf32, #tpu.memory_space<vmem>>, vector<32x128xf32>
    %c32 = arith.constant 32 : index
    %c0_19 = arith.constant 0 : index
    %55 = vector.load %arg5[%c32, %c0_19] : memref<48x128xf32, #tpu.memory_space<vmem>>, vector<1x128xf32>
    %cst_20 = arith.constant dense<0.000000e+00> : vector<8x128xf32>
    %56 = tpu.matmul %53, %54, %cst_20 {dimension_numbers = #tpu.dot_dimension_numbers<[1], [0], [0], [1], [0, 0, 1, 1], [], []>} : vector<8x32xf32>, vector<32x128xf32>, vector<8x128xf32> -> vector<8x128xf32>
    %57 = vector.broadcast %55 : vector<1x128xf32> to vector<8x128xf32>
    %58 = arith.addf %56, %57 : vector<8x128xf32>
    %c0_21 = arith.constant 0 : index
    %c0_22 = arith.constant 0 : index
    %c0_23 = arith.constant 0 : index
    %59 = vector.load %arg6[%c0_21, %c0_22, %c0_23] : memref<1x8x128xf32, #tpu.memory_space<vmem>>, vector<1x8x128xf32>
    %60 = vector.shape_cast %59 : vector<1x8x128xf32> to vector<8x128xf32>
    %61 = vector.shape_cast %58 : vector<8x128xf32> to vector<1x8x128xf32>
    tpu.vector_store %arg6[%c0_21, %c0_22, %c0_23], %61 {strides = array<i32>} : memref<1x8x128xf32, #tpu.memory_space<vmem>>, vector<1x8x128xf32>,
    return
  }
  func.func @transform_0(%arg0: i32) -> (i32, i32, i32) {
    %c0_i32 = arith.constant 0 : i32
    %c0_i32_0 = arith.constant 0 : i32
    %c0_i32_1 = arith.constant 0 : i32
    return %arg0, %c0_i32, %c0_i32_0 : i32, i32, i32
  }
  func.func @transform_1(%arg0: i32) -> (i32, i32) {
    %c0_i32 = arith.constant 0 : i32
    %c0_i32_0 = arith.constant 0 : i32
    %c0_i32_1 = arith.constant 0 : i32
    return %c0_i32, %c0_i32_0 : i32, i32
  }
  func.func @transform_2(%arg0: i32) -> (i32, i32) {
    %c0_i32 = arith.constant 0 : i32
    %c0_i32_0 = arith.constant 0 : i32
    %c0_i32_1 = arith.constant 0 : i32
    return %c0_i32, %c0_i32_0 : i32, i32
  }
  func.func @transform_3(%arg0: i32) -> (i32, i32) {
    %c0_i32 = arith.constant 0 : i32
    %c0_i32_0 = arith.constant 0 : i32
    %c0_i32_1 = arith.constant 0 : i32
    return %c0_i32, %c0_i32_0 : i32, i32
  }
  func.func @transform_4(%arg0: i32) -> (i32, i32) {
    %c0_i32 = arith.constant 0 : i32
    %c0_i32_0 = arith.constant 0 : i32
    %c0_i32_1 = arith.constant 0 : i32
    return %c0_i32, %c0_i32_0 : i32, i32
  }
  func.func @transform_5(%arg0: i32) -> (i32, i32, i32) {
    %c0_i32 = arith.constant 0 : i32
    %c0_i32_0 = arith.constant 0 : i32
    %c0_i32_1 = arith.constant 0 : i32
    return %arg0, %c0_i32, %c0_i32_0 : i32, i32, i32
  }
}

</mosaic_0001>

<bundles_post_ra>
// kernel: tpu_custom_call.1
= control target key start
LH: loop header
LB: loop body
LE: loop exit
PB: predicated region body
PF: predicated region fallthrough
CT: control target
= control target key end

     0   :  { %vm99_vm0 = vcmask 916480   ;;  %v3099_v57 = vmov 0.0   ;;  %s3093_s0 = inlined_call_operand.vmem [shape: f32[8,8,112], index: 0, kind: input, shape index: {}]   ;;  %s3094_s1 = inlined_call_operand.vmem [shape: f32[112,544], index: 1, kind: input, shape index: {}]   ;;  %s3095_s2 = inlined_call_operand.vmem [shape: f32[256,288], index: 2, kind: input, shape index: {}]   ;;  %s3096_s3 = inlined_call_operand.vmem [shape: f32[256,32], index: 3, kind: input, shape index: {}]   ;;  %s3097_s4 = inlined_call_operand.vmem [shape: f32[48,128], index: 4, kind: input, shape index: {}]   ;;  %s3098_s5 = inlined_call_operand.hbm [shape: f32[1,8,128], index: 5, kind: output, shape index: {}]  }
   0x1   :  { %v95_v0 = vld [vmem:[%s3094_s1 + $0x210] sm:$0xff]  ;;  %v97_v1 = vld [vmem:[%s3094_s1 + $0x220] sm:$0xff]  ;;  %v94_v2 = vld [vmem:[%s3094_s1 + $0x208] sm:$0xff]  ;;  %188 = vmatprep.mubr.f32.mxu0 %v3099_v57  ;;  %301 = vmatprep.mubr.f32.mxu1 %v3099_v57 }
   0x2   :  { %128 = vmatprep.subr.mxu0 %v95_v0  ;;  %241 = vmatprep.subr.mxu1 %v97_v1  ;;  %v96_v3 = vld [vmem:[%s3094_s1 + $0x218] sm:$0xff]  ;;  %v90_v4 = vld [vmem:[%s3094_s1 + $0x1e8] sm:$0xff]  ;;  %v89_v6 = vld [vmem:[%s3094_s1 + $0x1e0] sm:$0xff] }
   0x3   :  { %v92_v5 = vld [vmem:[%s3094_s1 + $0x1f8] sm:$0xff]  ;;  %129 = vmatpush1.msra.mxu0 %v94_v2  ;;  %242 = vmatpush1.msra.mxu1 %v96_v3  ;;  %v91_v7 = vld [vmem:[%s3094_s1 + $0x1f0] sm:$0xff]  ;;  %v85_v8 = vld [vmem:[%s3094_s1 + $0x1c0] sm:$0xff] }
   0x4   :  { %130 = vmatprep.subr.mxu0 %v90_v4  ;;  %243 = vmatprep.subr.mxu1 %v92_v5  ;;  %v87_v9 = vld [vmem:[%s3094_s1 + $0x1d0] sm:$0xff]  ;;  %v84_v10 = vld [vmem:[%s3094_s1 + $0x1b8] sm:$0xff]  ;;  %v86_v11 = vld [vmem:[%s3094_s1 + $0x1c8] sm:$0xff] }
   0x5   :  { %131 = vmatpush1.msra.mxu0 %v89_v6  ;;  %244 = vmatpush1.msra.mxu1 %v91_v7  ;;  %v80_v12 = vld [vmem:[%s3094_s1 + $0x198] sm:$0xff]  ;;  %v82_v13 = vld [vmem:[%s3094_s1 + $0x1a8] sm:$0xff]  ;;  %v79_v14 = vld [vmem:[%s3094_s1 + $0x190] sm:$0xff] }
   0x6   :  { %132 = vmatprep.subr.mxu0 %v85_v8  ;;  %245 = vmatprep.subr.mxu1 %v87_v9  ;;  %v81_v15 = vld [vmem:[%s3094_s1 + $0x1a0] sm:$0xff]  ;;  %v75_v16 = vld [vmem:[%s3094_s1 + $0x170] sm:$0xff]  ;;  %v74_v18 = vld [vmem:[%s3094_s1 + $0x168] sm:$0xff] }
   0x7   :  { %133 = vmatpush1.msra.mxu0 %v84_v10  ;;  %246 = vmatpush1.msra.mxu1 %v86_v11  ;;  %v77_v17 = vld [vmem:[%s3094_s1 + $0x180] sm:$0xff]  ;;  %v76_v19 = vld [vmem:[%s3094_s1 + $0x178] sm:$0xff]  ;;  %v70_v20 = vld [vmem:[%s3094_s1 + $0x148] sm:$0xff] }
   0x8   :  { %134 = vmatprep.subr.mxu0 %v80_v12  ;;  %247 = vmatprep.subr.mxu1 %v82_v13  ;;  %v72_v21 = vld [vmem:[%s3094_s1 + $0x158] sm:$0xff]  ;;  %v69_v22 = vld [vmem:[%s3094_s1 + $0x140] sm:$0xff]  ;;  %v71_v23 = vld [vmem:[%s3094_s1 + $0x150] sm:$0xff] }
   0x9   :  { %135 = vmatpush1.msra.mxu0 %v79_v14  ;;  %248 = vmatpush1.msra.mxu1 %v81_v15  ;;  %v65_v24 = vld [vmem:[%s3094_s1 + $0x120] sm:$0xff]  ;;  %v67_v25 = vld [vmem:[%s3094_s1 + $0x130] sm:$0xff]  ;;  %v64_v26 = vld [vmem:[%s3094_s1 + $0x118] sm:$0xff] }
   0xa   :  { %136 = vmatprep.subr.mxu0 %v75_v16  ;;  %249 = vmatprep.subr.mxu1 %v77_v17  ;;  %v66_v27 = vld [vmem:[%s3094_s1 + $0x128] sm:$0xff]  ;;  %v60_v28 = vld [vmem:[%s3094_s1 + $0xf8] sm:$0xff]  ;;  %v59_v30 = vld [vmem:[%s3094_s1 + $0xf0] sm:$0xff] }
   0xb   :  { %137 = vmatpush1.msra.mxu0 %v74_v18  ;;  %250 = vmatpush1.msra.mxu1 %v76_v19  ;;  %v62_v29 = vld [vmem:[%s3094_s1 + $0x108] sm:$0xff]  ;;  %v61_v31 = vld [vmem:[%s3094_s1 + $0x100] sm:$0xff]  ;;  %v55_v32 = vld [vmem:[%s3094_s1 + $0xd0] sm:$0xff] }
   0xc   :  { %138 = vmatprep.subr.mxu0 %v70_v20  ;;  %251 = vmatprep.subr.mxu1 %v72_v21  ;;  %v57_v33 = vld [vmem:[%s3094_s1 + $0xe0] sm:$0xff]  ;;  %v54_v34 = vld [vmem:[%s3094_s1 + $0xc8] sm:$0xff]  ;;  %v56_v35 = vld [vmem:[%s3094_s1 + $0xd8] sm:$0xff] }
   0xd   :  { %139 = vmatpush1.msra.mxu0 %v69_v22  ;;  %252 = vmatpush1.msra.mxu1 %v71_v23  ;;  %v50_v36 = vld [vmem:[%s3094_s1 + $0xa8] sm:$0xff]  ;;  %v52_v37 = vld [vmem:[%s3094_s1 + $0xb8] sm:$0xff]  ;;  %v49_v38 = vld [vmem:[%s3094_s1 + $0xa0] sm:$0xff] }
   0xe   :  { %140 = vmatprep.subr.mxu0 %v65_v24  ;;  %253 = vmatprep.subr.mxu1 %v67_v25  ;;  %v51_v39 = vld [vmem:[%s3094_s1 + $0xb0] sm:$0xff]  ;;  %v45_v40 = vld [vmem:[%s3094_s1 + $0x80] sm:$0xff]  ;;  %v44_v42 = vld [vmem:[%s3094_s1 + $0x78] sm:$0xff] }
   0xf   :  { %141 = vmatpush1.msra.mxu0 %v64_v26  ;;  %254 = vmatpush1.msra.mxu1 %v66_v27  ;;  %v47_v41 = vld [vmem:[%s3094_s1 + $0x90] sm:$0xff]  ;;  %v46_v43 = vld [vmem:[%s3094_s1 + $0x88] sm:$0xff]  ;;  %v40_v44 = vld [vmem:[%s3094_s1 + $0x58] sm:$0xff] }
  0x10   :  { %142 = vmatprep.subr.mxu0 %v60_v28  ;;  %255 = vmatprep.subr.mxu1 %v62_v29  ;;  %v42_v45 = vld [vmem:[%s3094_s1 + $0x68] sm:$0xff]  ;;  %v39_v46 = vld [vmem:[%s3094_s1 + $0x50] sm:$0xff]  ;;  %v41_v47 = vld [vmem:[%s3094_s1 + $0x60] sm:$0xff] }
  0x11   :  { %143 = vmatpush1.msra.mxu0 %v59_v30  ;;  %256 = vmatpush1.msra.mxu1 %v61_v31  ;;  %v35_v48 = vld [vmem:[%s3094_s1 + $0x30] sm:$0xff]  ;;  %v37_v49 = vld [vmem:[%s3094_s1 + $0x40] sm:$0xff]  ;;  %v34_v50 = vld [vmem:[%s3094_s1 + $0x28] sm:$0xff] }
  0x12   :  { %144 = vmatprep.subr.mxu0 %v55_v32  ;;  %257 = vmatprep.subr.mxu1 %v57_v33  ;;  %v36_v51 = vld [vmem:[%s3094_s1 + $0x38] sm:$0xff]  ;;  %v30_v52 = vld [vmem:[%s3094_s1 + $0x8] sm:$0xff]  ;;  %v29_v54 = vld [vmem:[%s3094_s1] sm:$0xff] }
  0x13   :  { %145 = vmatpush1.msra.mxu0 %v54_v34  ;;  %258 = vmatpush1.msra.mxu1 %v56_v35  ;;  %v32_v53 = vld [vmem:[%s3094_s1 + $0x18] sm:$0xff]  ;;  %v31_v55 = vld [vmem:[%s3094_s1 + $0x10] sm:$0xff]  ;;  %v2119_v56 = vld [vmem:[%s3093_s0] sm:$0xff] }
  0x14   :  { %146 = vmatprep.subr.mxu0 %v50_v36  ;;  %259 = vmatprep.subr.mxu1 %v52_v37  ;;  %v98_v58 = vld [vmem:[%s3094_s1 + $0x228] sm:$0xff]  ;;  %v533_v59 = vld [vmem:[%s3095_s2 + $0x170] sm:$0xff]  ;;  %v530_v62 = vld [vmem:[%s3095_s2 + $0x158] sm:$0xff] }
  0x15   :  { %147 = vmatpush1.msra.mxu0 %v49_v38  ;;  %260 = vmatpush1.msra.mxu1 %v51_v39  ;;  %v532_v60 = vld [vmem:[%s3095_s2 + $0x168] sm:$0xff]  ;;  %v93_v63 = vld [vmem:[%s3094_s1 + $0x200] sm:$0xff]  ;;  %v529_v0 = vld [vmem:[%s3095_s2 + $0x150] sm:$0xff] }
  0x16   :  { %148 = vmatprep.subr.mxu0 %v45_v40  ;;  %261 = vmatprep.subr.mxu1 %v47_v41  ;;  %v2141_v61 = vld [vmem:[%s3093_s0 + $0x8] sm:$0xff]  ;;  %v2161_v1 = vld [vmem:[%s3093_s0 + $0x10] sm:$0xff]  ;;  %v527_v2 = vld [vmem:[%s3095_s2 + $0x140] sm:$0xff] }
  0x17   :  { %149 = vmatpush1.msra.mxu0 %v44_v42  ;;  %262 = vmatpush1.msra.mxu1 %v46_v43  ;;  %v88_v3 = vld [vmem:[%s3094_s1 + $0x1d8] sm:$0xff]  ;;  %v524_v6 = vld [vmem:[%s3095_s2 + $0x128] sm:$0xff]  ;;  %v83_v7 = vld [vmem:[%s3094_s1 + $0x1b0] sm:$0xff] }
  0x18   :  { %150 = vmatprep.subr.mxu0 %v40_v44  ;;  %263 = vmatprep.subr.mxu1 %v42_v45  ;;  %v526_v4 = vld [vmem:[%s3095_s2 + $0x138] sm:$0xff]  ;;  %v523_v8 = vld [vmem:[%s3095_s2 + $0x120] sm:$0xff]  ;;  %v521_v10 = vld [vmem:[%s3095_s2 + $0x110] sm:$0xff] }
  0x19   :  { %151 = vmatpush1.msra.mxu0 %v39_v46  ;;  %264 = vmatpush1.msra.mxu1 %v41_v47  ;;  %v2181_v5 = vld [vmem:[%s3093_s0 + $0x18] sm:$0xff]  ;;  %v2201_v9 = vld [vmem:[%s3093_s0 + $0x20] sm:$0xff]  ;;  %v78_v11 = vld [vmem:[%s3094_s1 + $0x188] sm:$0xff] }
  0x1a   :  { %152 = vmatprep.subr.mxu0 %v35_v48  ;;  %265 = vmatprep.subr.mxu1 %v37_v49  ;;  %v520_v12 = vld [vmem:[%s3095_s2 + $0x108] sm:$0xff]  ;;  %v518_v14 = vld [vmem:[%s3095_s2 + $0xf8] sm:$0xff]  ;;  %v73_v15 = vld [vmem:[%s3094_s1 + $0x160] sm:$0xff] }
  0x1b   :  { %153 = vmatpush1.msra.mxu0 %v34_v50  ;;  %266 = vmatpush1.msra.mxu1 %v36_v51  ;;  %v2221_v13 = vld [vmem:[%s3093_s0 + $0x28] sm:$0xff]  ;;  %v517_v16 = vld [vmem:[%s3095_s2 + $0xf0] sm:$0xff] }
  0x1c   :  { %154 = vmatprep.subr.mxu0 %v30_v52  ;;  %267 = vmatprep.subr.mxu1 %v32_v53  ;;  %v2241_v17 = vld [vmem:[%s3093_s0 + $0x30] sm:$0xff] }
  0x1d   :  { %155 = vmatpush1.msra.mxu0 %v29_v54  ;;  %268 = vmatpush1.msra.mxu1 %v31_v55 }
  0x1e   :  { %1617 = vmatmul.mubr.msk.f32.vlgmr.msra.gmra.mxu0 %vm99_vm0, %v2119_v56  ;;  %1625 = vmatmul.mubr.msk.f32.vlgmr.msra.gmra.mxu1 %vm99_vm0, %v2119_v56 }
  0x1f   :  { %194 = vmatprep.mubr.f32.mxu0 %v3099_v57  ;;  %307 = vmatprep.mubr.f32.mxu1 %v3099_v57 }
  0x20   :  { %1791 = vmatprep.subr.mxu0 %v98_v58  ;;  %583 = vmatprep.subr.mxu1 %v533_v59 }
  0x21   :  { %1792 = vmatpush3.msra.mxu0 %v98_v58  ;;  %584 = vmatpush1.msra.mxu1 %v532_v60 }
  0x22   :  { %1618 = vmatmul.mubr.msk.f32.gmra.mxu0 %vm99_vm0, %v2141_v61  ;;  %1626 = vmatmul.mubr.msk.f32.gmra.mxu1 %vm99_vm0, %v2141_v61 }
  0x23   :  { %200 = vmatprep.mubr.f32.mxu0 %v3099_v57  ;;  %313 = vmatprep.mubr.f32.mxu1 %v3099_v57 }
  0x24   :  { %585 = vmatprep.subr.mxu1 %v530_v62  ;;  %1793 = vmatprep.subr.mxu0 %v93_v63 }
  0x25   :  { %586 = vmatpush1.msra.mxu1 %v529_v0  ;;  %1794 = vmatpush3.msra.mxu0 %v93_v63 }
  0x26   :  { %1619 = vmatmul.mubr.msk.f32.gmra.mxu0 %vm99_vm0, %v2161_v1  ;;  %1627 = vmatmul.mubr.msk.f32.gmra.mxu1 %vm99_vm0, %v2161_v1 }
  0x27   :  { %206 = vmatprep.mubr.f32.mxu0 %v3099_v57  ;;  %319 = vmatprep.mubr.f32.mxu1 %v3099_v57 }
  0x28   :  { %587 = vmatprep.subr.mxu1 %v527_v2  ;;  %1795 = vmatprep.subr.mxu0 %v88_v3 }
  0x29   :  { %588 = vmatpush1.msra.mxu1 %v526_v4  ;;  %1796 = vmatpush3.msra.mxu0 %v88_v3 }
  0x2a   :  { %1620 = vmatmul.mubr.msk.f32.gmra.mxu0 %vm99_vm0, %v2181_v5  ;;  %1628 = vmatmul.mubr.msk.f32.gmra.mxu1 %vm99_vm0, %v2181_v5 }
  0x2b   :  { %212 = vmatprep.mubr.f32.mxu0 %v3099_v57  ;;  %325 = vmatprep.mubr.f32.mxu1 %v3099_v57 }
  0x2c   :  { %589 = vmatprep.subr.mxu1 %v524_v6  ;;  %1797 = vmatprep.subr.mxu0 %v83_v7 }
  0x2d   :  { %590 = vmatpush1.msra.mxu1 %v523_v8  ;;  %1798 = vmatpush3.msra.mxu0 %v83_v7 }
  0x2e   :  { %1621 = vmatmul.mubr.msk.f32.gmra.mxu0 %vm99_vm0, %v2201_v9  ;;  %1629 = vmatmul.mubr.msk.f32.gmra.mxu1 %vm99_vm0, %v2201_v9 }
  0x2f   :  { %218 = vmatprep.mubr.f32.mxu0 %v3099_v57  ;;  %331 = vmatprep.mubr.f32.mxu1 %v3099_v57 }
  0x30   :  { %591 = vmatprep.subr.mxu1 %v521_v10  ;;  %1799 = vmatprep.subr.mxu0 %v78_v11 }
  0x31   :  { %592 = vmatpush1.msra.mxu1 %v520_v12  ;;  %1800 = vmatpush3.msra.mxu0 %v78_v11 }
  0x32   :  { %1622 = vmatmul.mubr.msk.f32.gmra.mxu0 %vm99_vm0, %v2221_v13  ;;  %1630 = vmatmul.mubr.msk.f32.gmra.mxu1 %vm99_vm0, %v2221_v13 }
  0x33   :  { %224 = vmatprep.mubr.f32.mxu0 %v3099_v57  ;;  %337 = vmatprep.mubr.f32.mxu1 %v3099_v57 }
  0x34   :  { %593 = vmatprep.subr.mxu1 %v518_v14  ;;  %1801 = vmatprep.subr.mxu0 %v73_v15 }
  0x35   :  { %10 = vsyncpa [#allocation3], 0  ;;  %594 = vmatpush1.msra.mxu1 %v517_v16  ;;  %v515_v18 = vld [vmem:[%s3095_s2 + $0xe0] sm:$0xff]  ;;  %1802 = vmatpush3.msra.mxu0 %v73_v15  ;;  %v68_v19 = vld [vmem:[%s3094_s1 + $0x138] sm:$0xff]  ;;  %s1912_s7 = smov 64   ;;  %s1913_s8 = smov 32  }
  0x36   :  { %1623 = vmatmul.mubr.msk.f32.gmra.mxu0 %vm99_vm0, %v2241_v17  ;;  %1631 = vmatmul.mubr.msk.f32.gmra.mxu1 %vm99_vm0, %v2241_v17  ;;  %v514_v20 = vld [vmem:[%s3095_s2 + $0xd8] sm:$0xff]  ;;  %v512_v22 = vld [vmem:[%s3095_s2 + $0xc8] sm:$0xff]  ;;  %v63_v23 = vld [vmem:[%s3094_s1 + $0x110] sm:$0xff]  ;;  %s1914_s21 = smov 96   ;;  %s1915_s23 = smov 88   ;;  %vm1017_vm1 = vcmask 261120  }
  0x37   :  { %230 = vmatprep.mubr.f32.mxu0 %v3099_v57  ;;  %343 = vmatprep.mubr.f32.mxu1 %v3099_v57  ;;  %v2261_v21 = vld [vmem:[%s3093_s0 + $0x38] sm:$0xff]  ;;  %v511_v24 = vld [vmem:[%s3095_s2 + $0xc0] sm:$0xff]  ;;  %v509_v25 = vld [vmem:[%s3095_s2 + $0xb0] sm:$0xff]  ;;  %vm1026_vm2 = vcmask 523264   ;;  %vm1035_vm3 = vcmask 785408   ;;  %vm1378_vm4 = vcmask 64512  }
  0x38   :  { %595 = vmatprep.subr.mxu1 %v515_v18  ;;  %1803 = vmatprep.subr.mxu0 %v68_v19  ;;  %v58_v26 = vld [vmem:[%s3094_s1 + $0xe8] sm:$0xff]  ;;  %v506_v28 = vld [vmem:[%s3095_s2 + $0x98] sm:$0xff]  ;;  %v53_v29 = vld [vmem:[%s3094_s1 + $0xc0] sm:$0xff]  ;;  %vm1916_vm5 = vmmov 0   ;;  %vm1516_vm14 = vcmask 1041409   ;;  %vm1518_vm15 = vcmask 1042434  }
  0x39   :  { %596 = vmatpush1.msra.mxu1 %v514_v20  ;;  %1804 = vmatpush3.msra.mxu0 %v68_v19  ;;  %v508_v27 = vld [vmem:[%s3095_s2 + $0xa8] sm:$0xff]  ;;  %v505_v30 = vld [vmem:[%s3095_s2 + $0x90] sm:$0xff]  ;;  %v503_v31 = vld [vmem:[%s3095_s2 + $0x80] sm:$0xff] }
  0x3a   :  { %1624 = vmatmul.mubr.msk.f32.gmra.mxu0 %vm99_vm0, %v2261_v21  ;;  %1632 = vmatmul.mubr.msk.f32.gmra.mxu1 %vm99_vm0, %v2261_v21  ;;  %v48_v32 = vld [vmem:[%s3094_s1 + $0x98] sm:$0xff]  ;;  %v500_v34 = vld [vmem:[%s3095_s2 + $0x68] sm:$0xff]  ;;  %v43_v35 = vld [vmem:[%s3094_s1 + $0x70] sm:$0xff] }
  0x3b   :  { %597 = vmatprep.subr.mxu1 %v512_v22  ;;  %1805 = vmatprep.subr.mxu0 %v63_v23  ;;  %v502_v33 = vld [vmem:[%s3095_s2 + $0x78] sm:$0xff]  ;;  %v499_v36 = vld [vmem:[%s3095_s2 + $0x60] sm:$0xff]  ;;  %v497_v37 = vld [vmem:[%s3095_s2 + $0x50] sm:$0xff] }
  0x3c   :  { %598 = vmatpush1.msra.mxu1 %v511_v24  ;;  %1806 = vmatpush3.msra.mxu0 %v63_v23  ;;  %v38_v38 = vld [vmem:[%s3094_s1 + $0x48] sm:$0xff]  ;;  %v494_v40 = vld [vmem:[%s3095_s2 + $0x38] sm:$0xff]  ;;  %v33_v41 = vld [vmem:[%s3094_s1 + $0x20] sm:$0xff] }
  0x3d   :  { %599 = vmatprep.subr.mxu1 %v509_v25  ;;  %1807 = vmatprep.subr.mxu0 %v58_v26  ;;  %v496_v39 = vld [vmem:[%s3095_s2 + $0x48] sm:$0xff]  ;;  %v493_v42 = vld [vmem:[%s3095_s2 + $0x30] sm:$0xff]  ;;  %v491_v43 = vld [vmem:[%s3095_s2 + $0x20] sm:$0xff] }
  0x3e   :  { %600 = vmatpush1.msra.mxu1 %v508_v27  ;;  %1808 = vmatpush3.msra.mxu0 %v58_v26  ;;  %v490_v44 = vld [vmem:[%s3095_s2 + $0x18] sm:$0xff]  ;;  %v488_v45 = vld [vmem:[%s3095_s2 + $0x8] sm:$0xff]  ;;  %v487_v47 = vld [vmem:[%s3095_s2] sm:$0xff] }
  0x3f   :  { %601 = vmatprep.subr.mxu1 %v506_v28  ;;  %1809 = vmatprep.subr.mxu0 %v53_v29  ;;  %v582_v46 = vld [vmem:[%s3095_s2 + $0x2f8] sm:$0xff]  ;;  %v581_v49 = vld [vmem:[%s3095_s2 + $0x2f0] sm:$0xff]  ;;  %v579_v50 = vld [vmem:[%s3095_s2 + $0x2e0] sm:$0xff] }
  0x40   :  { %602 = vmatpush1.msra.mxu1 %v505_v30  ;;  %1810 = vmatpush3.msra.mxu0 %v53_v29  ;;  %v534_v48 = vld [vmem:[%s3095_s2 + $0x178] sm:$0xff]  ;;  %v580_v51 = vld [vmem:[%s3095_s2 + $0x2e8] sm:$0xff]  ;;  %v531_v52 = vld [vmem:[%s3095_s2 + $0x160] sm:$0xff] }
  0x41   :  { %603 = vmatprep.subr.mxu1 %v503_v31  ;;  %1811 = vmatprep.subr.mxu0 %v48_v32  ;;  %v578_v53 = vld [vmem:[%s3095_s2 + $0x2d8] sm:$0xff]  ;;  %v576_v54 = vld [vmem:[%s3095_s2 + $0x2c8] sm:$0xff]  ;;  %v577_v55 = vld [vmem:[%s3095_s2 + $0x2d0] sm:$0xff] }
  0x42   :  { %604 = vmatpush1.msra.mxu1 %v502_v33  ;;  %1812 = vmatpush3.msra.mxu0 %v48_v32  ;;  %v575_v58 = vld [vmem:[%s3095_s2 + $0x2c0] sm:$0xff]  ;;  %v573_v59 = vld [vmem:[%s3095_s2 + $0x2b0] sm:$0xff]  ;;  %v574_v60 = vld [vmem:[%s3095_s2 + $0x2b8] sm:$0xff] }
  0x43   :  { %605 = vmatprep.subr.mxu1 %v500_v34  ;;  %1813 = vmatprep.subr.mxu0 %v43_v35  ;;  %v572_v62 = vld [vmem:[%s3095_s2 + $0x2a8] sm:$0xff]  ;;  %v570_v63 = vld [vmem:[%s3095_s2 + $0x298] sm:$0xff]  ;;  %v571_v0 = vld [vmem:[%s3095_s2 + $0x2a0] sm:$0xff] }
  0x44   :  { %606 = vmatpush1.msra.mxu1 %v499_v36  ;;  %1814 = vmatpush3.msra.mxu0 %v43_v35  ;;  %v522_v2 = vld [vmem:[%s3095_s2 + $0x118] sm:$0xff]  ;;  %v569_v3 = vld [vmem:[%s3095_s2 + $0x290] sm:$0xff]  ;;  %v567_v4 = vld [vmem:[%s3095_s2 + $0x280] sm:$0xff] }
  0x45   :  { %607 = vmatprep.subr.mxu1 %v497_v37  ;;  %1815 = vmatprep.subr.mxu0 %v38_v38  ;;  %v568_v6 = vld [vmem:[%s3095_s2 + $0x288] sm:$0xff]  ;;  %v519_v7 = vld [vmem:[%s3095_s2 + $0x100] sm:$0xff]  ;;  %v566_v8 = vld [vmem:[%s3095_s2 + $0x278] sm:$0xff] }
  0x46   :  { %608 = vmatpush1.msra.mxu1 %v496_v39  ;;  %1816 = vmatpush3.msra.mxu0 %v38_v38  ;;  %v564_v10 = vld [vmem:[%s3095_s2 + $0x268] sm:$0xff]  ;;  %v565_v11 = vld [vmem:[%s3095_s2 + $0x270] sm:$0xff]  ;;  %v563_v14 = vld [vmem:[%s3095_s2 + $0x260] sm:$0xff] }
  0x47   :  { %609 = vmatprep.subr.mxu1 %v494_v40  ;;  %1817 = vmatprep.subr.mxu0 %v33_v41  ;;  %v516_v12 = vld [vmem:[%s3095_s2 + $0xe8] sm:$0xff]  ;;  %v561_v15 = vld [vmem:[%s3095_s2 + $0x250] sm:$0xff]  ;;  %v562_v16 = vld [vmem:[%s3095_s2 + $0x258] sm:$0xff] }
  0x48   :  { %610 = vmatpush1.msra.mxu1 %v493_v42  ;;  %1818 = vmatpush3.msra.mxu0 %v33_v41  ;;  %v513_v18 = vld [vmem:[%s3095_s2 + $0xd0] sm:$0xff]  ;;  %v560_v19 = vld [vmem:[%s3095_s2 + $0x248] sm:$0xff]  ;;  %v558_v20 = vld [vmem:[%s3095_s2 + $0x238] sm:$0xff] }
  0x49   :  { %611 = vmatprep.subr.mxu1 %v491_v43  ;;  %1819 = vmatprep.mubr.msk.f32.mxu0 %vm99_vm0, %v2119_v56  ;;  %v528_v56 = vld [vmem:[%s3095_s2 + $0x148] sm:$0xff]  ;;  %v559_v22 = vld [vmem:[%s3095_s2 + $0x240] sm:$0xff]  ;;  %v557_v23 = vld [vmem:[%s3095_s2 + $0x230] sm:$0xff] }
  0x4a   :  { %612 = vmatpush1.msra.mxu1 %v490_v44  ;;  %1820 = vmatmul.mubr.msk.f32.vlgmr.msra.gmra.mxu0 %vm99_vm0, %v2141_v61  ;;  %v525_v61 = vld [vmem:[%s3095_s2 + $0x130] sm:$0xff]  ;;  %v510_v24 = vld [vmem:[%s3095_s2 + $0xb8] sm:$0xff]  ;;  %v556_v25 = vld [vmem:[%s3095_s2 + $0x228] sm:$0xff] }
  0x4b   :  { %613 = vmatprep.subr.mxu1 %v488_v45  ;;  %1674 = vmatprep.subr.mxu0 %v582_v46  ;;  %v554_v26 = vld [vmem:[%s3095_s2 + $0x218] sm:$0xff]  ;;  %v555_v27 = vld [vmem:[%s3095_s2 + $0x220] sm:$0xff]  ;;  %v553_v28 = vld [vmem:[%s3095_s2 + $0x210] sm:$0xff] }
  0x4c   :  { %614 = vmatpush1.msra.mxu1 %v487_v47  ;;  %1675 = vmatpush3.msra.mxu0 %v534_v48  ;;  %v507_v29 = vld [vmem:[%s3095_s2 + $0xa0] sm:$0xff]  ;;  %v552_v30 = vld [vmem:[%s3095_s2 + $0x208] sm:$0xff]  ;;  %v550_v31 = vld [vmem:[%s3095_s2 + $0x1f8] sm:$0xff] }
  0x4d   :  { %615 = vmatprep.subr.mxu1 %v581_v49  ;;  %1676 = vmatprep.subr.mxu0 %v579_v50  ;;  %v548_v32 = vld [vmem:[%s3095_s2 + $0x1e8] sm:$0xff]  ;;  %v549_v33 = vld [vmem:[%s3095_s2 + $0x1f0] sm:$0xff]  ;;  %v547_v34 = vld [vmem:[%s3095_s2 + $0x1e0] sm:$0xff] }
  0x4e   :  { %616 = vmatpush2.msra.mxu1 %v580_v51  ;;  %1677 = vmatpush3.msra.mxu0 %v531_v52  ;;  %v501_v35 = vld [vmem:[%s3095_s2 + $0x70] sm:$0xff]  ;;  %v546_v37 = vld [vmem:[%s3095_s2 + $0x1d8] sm:$0xff]  ;;  %v495_v41 = vld [vmem:[%s3095_s2 + $0x40] sm:$0xff] }
  0x4f   :  { %617 = vmatprep.subr.mxu1 %v578_v53  ;;  %1678 = vmatprep.subr.mxu0 %v576_v54  ;;  %v545_v36 = vld [vmem:[%s3095_s2 + $0x1d0] sm:$0xff]  ;;  %v498_v38 = vld [vmem:[%s3095_s2 + $0x58] sm:$0xff]  ;;  %v539_v42 = vld [vmem:[%s3095_s2 + $0x1a0] sm:$0xff] }
  0x50   :  { %618 = vmatpush2.msra.mxu1 %v577_v55  ;;  %1679 = vmatpush3.msra.mxu0 %v528_v56  ;;  %v542_v39 = vld [vmem:[%s3095_s2 + $0x1b8] sm:$0xff]  ;;  %v541_v40 = vld [vmem:[%s3095_s2 + $0x1b0] sm:$0xff]  ;;  %v540_v43 = vld [vmem:[%s3095_s2 + $0x1a8] sm:$0xff] }
  0x51   :  { %619 = vmatprep.subr.mxu1 %v575_v58  ;;  %1680 = vmatprep.subr.mxu0 %v573_v59  ;;  %v492_v44 = vld [vmem:[%s3095_s2 + $0x28] sm:$0xff]  ;;  %v537_v46 = vld [vmem:[%s3095_s2 + $0x190] sm:$0xff] }
  0x52   :  { %620 = vmatpush2.msra.mxu1 %v574_v60  ;;  %1681 = vmatpush3.msra.mxu0 %v525_v61  ;;  %v536_v45 = vld [vmem:[%s3095_s2 + $0x188] sm:$0xff]  ;;  %v489_v47 = vld [vmem:[%s3095_s2 + $0x10] sm:$0xff] }
  0x53   :  { %621 = vmatprep.subr.mxu1 %v572_v62  ;;  %1682 = vmatprep.subr.mxu0 %v570_v63 }
  0x54   :  { %622 = vmatpush2.msra.mxu1 %v571_v0  ;;  %1683 = vmatpush3.msra.mxu0 %v522_v2 }
  0x55   :  { %623 = vmatprep.subr.mxu1 %v569_v3  ;;  %1684 = vmatprep.subr.mxu0 %v567_v4 }
  0x56   :  { %624 = vmatpush2.msra.mxu1 %v568_v6  ;;  %1685 = vmatpush3.msra.mxu0 %v519_v7 }
  0x57   :  { %625 = vmatprep.subr.mxu1 %v566_v8  ;;  %1686 = vmatprep.subr.mxu0 %v564_v10 }
  0x58   :  { %626 = vmatpush2.msra.mxu1 %v565_v11  ;;  %1687 = vmatpush3.msra.mxu0 %v516_v12 }
  0x59   :  { %627 = vmatprep.subr.mxu1 %v563_v14  ;;  %1688 = vmatprep.subr.mxu0 %v561_v15 }
  0x5a   :  { %628 = vmatpush2.msra.mxu1 %v562_v16  ;;  %1689 = vmatpush3.msra.mxu0 %v513_v18 }
  0x5b   :  { %629 = vmatprep.subr.mxu1 %v560_v19  ;;  %1690 = vmatprep.subr.mxu0 %v558_v20 }
  0x5c   :  { %630 = vmatpush2.msra.mxu1 %v559_v22  ;;  %1822 = vmatprep.mubr.msk.f32.mxu0 %vm99_vm0, %v2161_v1  ;;  %v551_v1 = vld [vmem:[%s3095_s2 + $0x200] sm:$0xff] }
  0x5d   :  { %631 = vmatprep.subr.mxu1 %v557_v23  ;;  %1691 = vmatpush3.msra.mxu0 %v510_v24 }
  0x5e   :  { %632 = vmatpush2.msra.mxu1 %v556_v25  ;;  %1823 = vmatmul.mubr.msk.f32.gmra.mxu0 %vm99_vm0, %v2181_v5  ;;  %v504_v5 = vld [vmem:[%s3095_s2 + $0x88] sm:$0xff] }
  0x5f   :  { %633 = vmatprep.subr.mxu1 %v554_v26  ;;  %1692 = vmatprep.subr.mxu0 %v555_v27 }
  0x60   :  { %634 = vmatpush2.msra.mxu1 %v553_v28  ;;  %1693 = vmatpush3.msra.mxu0 %v507_v29 }
  0x61   :  { %635 = vmatprep.subr.mxu1 %v551_v1  ;;  %1694 = vmatprep.subr.mxu0 %v552_v30 }
  0x62   :  { %1825 = vmatprep.mubr.msk.f32.mxu0 %vm99_vm0, %v2201_v9  ;;  %636 = vmatpush2.msra.mxu1 %v550_v31  ;;  %v544_v9 = vld [vmem:[%s3095_s2 + $0x1c8] sm:$0xff] }
  0x63   :  { %1695 = vmatpush3.msra.mxu0 %v504_v5  ;;  %637 = vmatprep.subr.mxu1 %v548_v32 }
  0x64   :  { %1826 = vmatmul.mubr.msk.f32.gmra.mxu0 %vm99_vm0, %v2221_v13  ;;  %1696 = vmatprep.subr.mxu0 %v549_v33  ;;  %v543_v13 = vld [vmem:[%s3095_s2 + $0x1c0] sm:$0xff] }
  0x65   :  { %638 = vmatpush2.msra.mxu1 %v547_v34  ;;  %1697 = vmatpush3.msra.mxu0 %v501_v35 }
  0x66   :  { %639 = vmatprep.subr.mxu1 %v545_v36  ;;  %1698 = vmatprep.subr.mxu0 %v546_v37 }
  0x67   :  { %1828 = vmatprep.mubr.msk.f32.mxu0 %vm99_vm0, %v2241_v17  ;;  %640 = vmatpush2.msra.mxu1 %v544_v9  ;;  %v538_v17 = vld [vmem:[%s3095_s2 + $0x198] sm:$0xff] }
  0x68   :  { %1699 = vmatpush3.msra.mxu0 %v498_v38  ;;  %641 = vmatprep.subr.mxu1 %v542_v39 }
  0x69   :  { %1829 = vmatmul.mubr.msk.f32.gmra.mxu0 %vm99_vm0, %v2261_v21  ;;  %1700 = vmatprep.subr.mxu0 %v543_v13  ;;  %v535_v21 = vld [vmem:[%s3095_s2 + $0x180] sm:$0xff]  ;;  %vm1520_vm0 = vcmask 1043459  }
  0x6a   :  { %642 = vmatpush2.msra.mxu1 %v541_v40  ;;  %1701 = vmatpush3.msra.mxu0 %v495_v41 }
  0x6b   :  { %643 = vmatprep.subr.mxu1 %v539_v42  ;;  %1702 = vmatprep.subr.mxu0 %v540_v43 }
  0x6c   :  { %644 = vmatpush2.msra.mxu1 %v538_v17  ;;  %1703 = vmatpush3.msra.mxu0 %v492_v44 }
  0x6d   :  { %645 = vmatprep.subr.mxu1 %v536_v45  ;;  %1704 = vmatprep.subr.mxu0 %v537_v46 }
  0x6e   :  { %646 = vmatpush2.msra.mxu1 %v535_v21  ;;  %1705 = vmatpush3.msra.mxu0 %v489_v47 }
  0xde   :  { %v190_v48 = vpop.f32.mrf.mxu0  ;;  %v2550_v49 = vpop.f32.mrf.mxu1 }
  0xdf   :  { %v455_v50 = vmul.f32 %v2550_v49, %v190_v48 }
  0xe0   :  { %v192_v51 = vpop.f32.mrf.mxu0  ;;  %v2553_v52 = vpop.f32.mrf.mxu1 }
  0xe1   :  { %v456_v53 = vmul.f32 %v2553_v52, %v192_v51  ;;  %v2561_v59 = vmax.f32 %v455_v50, 0.0  ;;  %v1227_v51 = vld [vmem:[%s3096_s3 + $0xf8] sm:$0xff] }
  0xe2   :  { %v196_v54 = vpop.f32.mrf.mxu0  ;;  %v2556_v55 = vpop.f32.mrf.mxu1  ;;  %1730 = vmatprep.subr.mxu0 %v1227_v51  ;;  %1842 = vmatprep.subr.mxu1 %v1227_v51 }
  0xe3   :  { %v2558_v56 = vmax.f32 %v456_v53, 0.0  ;;  %v457_v58 = vmul.f32 %v2556_v55, %v196_v54  ;;  %v1211_v53 = vld [vmem:[%s3096_s3 + $0x78] sm:$0xff]  ;;  %v1226_v54 = vld [vmem:[%s3096_s3 + $0xf0] sm:$0xff] }
  0xe4   :  { %v198_v60 = vpop.f32.mrf.mxu0  ;;  %v2563_v61 = vpop.f32.mrf.mxu1 }
  0xe5   :  { %647 = vmatprep.mubr.f32.mxu1 %v2558_v56  ;;  %760 = vmatprep.mubr.f32.mxu0 %v2558_v56  ;;  %v458_v62 = vmul.f32 %v2563_v61, %v198_v60  ;;  %v2568_v63 = vmax.f32 %v457_v58, 0.0  ;;  %v1210_v60 = vld [vmem:[%s3096_s3 + $0x70] sm:$0xff] }
  0xe6   :  { %648 = vmatmul.mubr.f32.vlgmr.msra.gmra.mxu1 %v2561_v59  ;;  %761 = vmatmul.mubr.f32.vlgmr.msra.gmra.mxu0 %v2561_v59  ;;  %v202_v0 = vpop.f32.mrf.mxu0  ;;  %v2572_v2 = vpop.f32.mrf.mxu1 }
  0xe7   :  { %v2574_v3 = vmax.f32 %v458_v62, 0.0  ;;  %v459_v4 = vmul.f32 %v2572_v2, %v202_v0  ;;  %1731 = vmatpush3.msra.mxu0 %v1211_v53  ;;  %1858 = vmatpush3.msra.mxu1 %v1211_v53  ;;  %v1225_v0 = vld [vmem:[%s3096_s3 + $0xe8] sm:$0xff] }
  0xe8   :  { %v204_v6 = vpop.f32.mrf.mxu0  ;;  %v2577_v7 = vpop.f32.mrf.mxu1  ;;  %1732 = vmatprep.subr.mxu0 %v1226_v54  ;;  %1843 = vmatprep.subr.mxu1 %v1226_v54  ;;  %v1201_v53 = vld [vmem:[%s3096_s3 + $0x28] sm:$0xff]  ;;  %v1216_v54 = vld [vmem:[%s3096_s3 + $0xa0] sm:$0xff] }
  0xe9   :  { %653 = vmatprep.mubr.f32.mxu1 %v2574_v3  ;;  %765 = vmatprep.mubr.f32.mxu0 %v2574_v3  ;;  %v460_v8 = vmul.f32 %v2577_v7, %v204_v6  ;;  %v2584_v10 = vmax.f32 %v459_v4, 0.0  ;;  %v1209_v4 = vld [vmem:[%s3096_s3 + $0x68] sm:$0xff]  ;;  %v1224_v6 = vld [vmem:[%s3096_s3 + $0xe0] sm:$0xff] }
  0xea   :  { %654 = vmatmul.mubr.f32.gmra.mxu1 %v2568_v63  ;;  %766 = vmatmul.mubr.f32.gmra.mxu0 %v2568_v63  ;;  %v208_v11 = vpop.f32.mrf.mxu0  ;;  %v2586_v12 = vpop.f32.mrf.mxu1 }
  0xeb   :  { %v2588_v14 = vmax.f32 %v460_v8, 0.0  ;;  %v461_v15 = vmul.f32 %v2586_v12, %v208_v11  ;;  %1733 = vmatpush3.msra.mxu0 %v1210_v60  ;;  %1859 = vmatpush3.msra.mxu1 %v1210_v60  ;;  %v1208_v8 = vld [vmem:[%s3096_s3 + $0x60] sm:$0xff]  ;;  %v1223_v11 = vld [vmem:[%s3096_s3 + $0xd8] sm:$0xff] }
  0xec   :  { %v210_v16 = vpop.f32.mrf.mxu0  ;;  %v2591_v18 = vpop.f32.mrf.mxu1  ;;  %1734 = vmatprep.subr.mxu0 %v1225_v0  ;;  %1844 = vmatprep.subr.mxu1 %v1225_v0 }
  0xed   :  { %659 = vmatprep.mubr.f32.mxu1 %v2588_v14  ;;  %770 = vmatprep.mubr.f32.mxu0 %v2588_v14  ;;  %v462_v19 = vmul.f32 %v2591_v18, %v210_v16  ;;  %v2598_v20 = vmax.f32 %v461_v15, 0.0  ;;  %v1207_v16 = vld [vmem:[%s3096_s3 + $0x58] sm:$0xff] }
  0xee   :  { %660 = vmatmul.mubr.f32.gmra.mxu1 %v2584_v10  ;;  %771 = vmatmul.mubr.f32.gmra.mxu0 %v2584_v10  ;;  %v214_v22 = vpop.f32.mrf.mxu0  ;;  %v2600_v23 = vpop.f32.mrf.mxu1 }
  0xef   :  { %v2602_v24 = vmax.f32 %v462_v19, 0.0  ;;  %v463_v25 = vmul.f32 %v2600_v23, %v214_v22  ;;  %1735 = vmatpush3.msra.mxu0 %v1209_v4  ;;  %1860 = vmatpush3.msra.mxu1 %v1209_v4  ;;  %v1222_v19 = vld [vmem:[%s3096_s3 + $0xd0] sm:$0xff]  ;;  %v1200_v4 = vld [vmem:[%s3096_s3 + $0x20] sm:$0xff] }
  0xf0   :  { %v216_v26 = vpop.f32.mrf.mxu0  ;;  %v2605_v27 = vpop.f32.mrf.mxu1  ;;  %1736 = vmatprep.subr.mxu0 %v1224_v6  ;;  %1845 = vmatprep.subr.mxu1 %v1224_v6  ;;  %v1206_v22 = vld [vmem:[%s3096_s3 + $0x50] sm:$0xff] }
  0xf1   :  { %v464_v28 = vmul.f32 %v2605_v27, %v216_v26  ;;  %665 = vmatprep.mubr.f32.mxu1 %v2602_v24  ;;  %775 = vmatprep.mubr.f32.mxu0 %v2602_v24  ;;  %v2610_v29 = vmax.f32 %v463_v25, 0.0 }
  0xf2   :  { %666 = vmatmul.mubr.f32.gmra.mxu1 %v2598_v20  ;;  %776 = vmatmul.mubr.f32.gmra.mxu0 %v2598_v20  ;;  %v220_v1 = vpop.f32.mrf.mxu0  ;;  %v2614_v30 = vpop.f32.mrf.mxu1 }
  0xf3   :  { %v2616_v31 = vmax.f32 %v464_v28, 0.0  ;;  %v465_v5 = vmul.f32 %v2614_v30, %v220_v1  ;;  %1737 = vmatpush3.msra.mxu0 %v1208_v8  ;;  %1861 = vmatpush3.msra.mxu1 %v1208_v8  ;;  %v1221_v1 = vld [vmem:[%s3096_s3 + $0xc8] sm:$0xff]  ;;  %v1215_v8 = vld [vmem:[%s3096_s3 + $0x98] sm:$0xff] }
  0xf4   :  { %v222_v32 = vpop.f32.mrf.mxu0  ;;  %v2619_v33 = vpop.f32.mrf.mxu1  ;;  %1738 = vmatprep.subr.mxu0 %v1223_v11  ;;  %1846 = vmatprep.subr.mxu1 %v1223_v11  ;;  %v1199_v11 = vld [vmem:[%s3096_s3 + $0x18] sm:$0xff] }
  0xf5   :  { %v466_v34 = vmul.f32 %v2619_v33, %v222_v32  ;;  %671 = vmatprep.mubr.f32.mxu1 %v2616_v31  ;;  %780 = vmatprep.mubr.f32.mxu0 %v2616_v31  ;;  %v2624_v35 = vmax.f32 %v465_v5, 0.0  ;;  %v1205_v5 = vld [vmem:[%s3096_s3 + $0x48] sm:$0xff]  ;;  %v1220_v32 = vld [vmem:[%s3096_s3 + $0xc0] sm:$0xff] }
  0xf6   :  { %672 = vmatmul.mubr.f32.gmra.mxu1 %v2610_v29  ;;  %781 = vmatmul.mubr.f32.gmra.mxu0 %v2610_v29  ;;  %v226_v36 = vpop.f32.mrf.mxu0  ;;  %v2628_v37 = vpop.f32.mrf.mxu1 }
  0xf7   :  { %v2630_v9 = vmax.f32 %v466_v34, 0.0  ;;  %v467_v38 = vmul.f32 %v2628_v37, %v226_v36  ;;  %1739 = vmatpush3.msra.mxu0 %v1207_v16  ;;  %1862 = vmatpush3.msra.mxu1 %v1207_v16  ;;  %v1204_v34 = vld [vmem:[%s3096_s3 + $0x40] sm:$0xff]  ;;  %v1214_v16 = vld [vmem:[%s3096_s3 + $0x90] sm:$0xff] }
  0xf8   :  { %v228_v39 = vpop.f32.mrf.mxu0  ;;  %v2633_v13 = vpop.f32.mrf.mxu1  ;;  %1740 = vmatprep.subr.mxu0 %v1222_v19  ;;  %1847 = vmatprep.subr.mxu1 %v1222_v19 }
  0xf9   :  { %677 = vmatprep.mubr.f32.mxu1 %v2630_v9  ;;  %785 = vmatprep.mubr.f32.mxu0 %v2630_v9  ;;  %v468_v40 = vmul.f32 %v2633_v13, %v228_v39  ;;  %v2640_v41 = vmax.f32 %v467_v38, 0.0  ;;  %v1219_v38 = vld [vmem:[%s3096_s3 + $0xb8] sm:$0xff] }
  0xfa   :  { %678 = vmatmul.mubr.f32.gmra.mxu1 %v2624_v35  ;;  %786 = vmatmul.mubr.f32.gmra.mxu0 %v2624_v35  ;;  %v232_v42 = vpop.f32.mrf.mxu0  ;;  %v2642_v43 = vpop.f32.mrf.mxu1  ;;  %v1203_v39 = vld [vmem:[%s3096_s3 + $0x38] sm:$0xff] }
  0xfb   :  { %v2644_v17 = vmax.f32 %v468_v40, 0.0  ;;  %v469_v44 = vmul.f32 %v2642_v43, %v232_v42  ;;  %1741 = vmatpush3.msra.mxu0 %v1206_v22  ;;  %1863 = vmatpush3.msra.mxu1 %v1206_v22  ;;  %v1218_v40 = vld [vmem:[%s3096_s3 + $0xb0] sm:$0xff] }
  0xfc   :  { %v234_v45 = vpop.f32.mrf.mxu0  ;;  %v2647_v46 = vpop.f32.mrf.mxu1  ;;  %1742 = vmatprep.subr.mxu0 %v1221_v1  ;;  %1848 = vmatprep.subr.mxu1 %v1221_v1  ;;  %v1202_v42 = vld [vmem:[%s3096_s3 + $0x30] sm:$0xff] }
  0xfd   :  { %683 = vmatprep.mubr.f32.mxu1 %v2644_v17  ;;  %790 = vmatprep.mubr.f32.mxu0 %v2644_v17  ;;  %v470_v21 = vmul.f32 %v2647_v46, %v234_v45  ;;  %v2654_v47 = vmax.f32 %v469_v44, 0.0  ;;  %v1198_v1 = vld [vmem:[%s3096_s3 + $0x10] sm:$0xff] }
  0xfe   :  { %684 = vmatmul.mubr.f32.gmra.mxu1 %v2640_v41  ;;  %791 = vmatmul.mubr.f32.gmra.mxu0 %v2640_v41 }
  0xff   :  { %v2656_v48 = vmax.f32 %v470_v21, 0.0  ;;  %1743 = vmatpush3.msra.mxu0 %v1205_v5  ;;  %1864 = vmatpush3.msra.mxu1 %v1205_v5  ;;  %v1217_v21 = vld [vmem:[%s3096_s3 + $0xa8] sm:$0xff] }
 0x100   :  { %1744 = vmatprep.subr.mxu0 %v1220_v32  ;;  %1849 = vmatprep.subr.mxu1 %v1220_v32  ;;  %v1213_v32 = vld [vmem:[%s3096_s3 + $0x88] sm:$0xff] }
 0x101   :  { %689 = vmatprep.mubr.f32.mxu1 %v2656_v48  ;;  %795 = vmatprep.mubr.f32.mxu0 %v2656_v48 }
 0x102   :  { %690 = vmatmul.mubr.f32.gmra.mxu1 %v2654_v47  ;;  %796 = vmatmul.mubr.f32.gmra.mxu0 %v2654_v47 }
 0x103   :  { %1745 = vmatpush3.msra.mxu0 %v1204_v34  ;;  %1865 = vmatpush3.msra.mxu1 %v1204_v34  ;;  %v1197_v34 = vld [vmem:[%s3096_s3 + $0x8] sm:$0xff] }
 0x104   :  { %1746 = vmatprep.subr.mxu0 %v1219_v38  ;;  %1850 = vmatprep.subr.mxu1 %v1219_v38 }
 0x105   :  { %1747 = vmatpush3.msra.mxu0 %v1203_v39  ;;  %1866 = vmatpush3.msra.mxu1 %v1203_v39 }
 0x106   :  { %1748 = vmatprep.subr.mxu0 %v1218_v40  ;;  %1851 = vmatprep.subr.mxu1 %v1218_v40 }
 0x107   :  { %1749 = vmatpush3.msra.mxu0 %v1202_v42  ;;  %1867 = vmatpush3.msra.mxu1 %v1202_v42  ;;  %v1212_v42 = vld [vmem:[%s3096_s3 + $0x80] sm:$0xff] }
 0x108   :  { %1750 = vmatprep.subr.mxu0 %v1217_v21  ;;  %1852 = vmatprep.subr.mxu1 %v1217_v21 }
 0x109   :  { %1751 = vmatpush3.msra.mxu0 %v1201_v53  ;;  %1868 = vmatpush3.msra.mxu1 %v1201_v53 }
 0x10a   :  { %v2662_v50 = vpop.f32.mrf.mxu0  ;;  %1752 = vmatprep.subr.mxu0 %v1216_v54  ;;  %1853 = vmatprep.subr.mxu1 %v1216_v54 }
 0x10b   :  { %1753 = vmatpush3.msra.mxu0 %v1200_v4  ;;  %1869 = vmatpush3.msra.mxu1 %v1200_v4 }
 0x10c   :  { %v2673_v58 = vpop.f32.mrf.mxu0  ;;  %1754 = vmatprep.subr.mxu0 %v1215_v8  ;;  %1854 = vmatprep.subr.mxu1 %v1215_v8 }
 0x10d   :  { %1755 = vmatpush3.msra.mxu0 %v1199_v11  ;;  %1870 = vmatpush3.msra.mxu1 %v1199_v11 }
 0x10e   :  { %1756 = vmatprep.subr.mxu0 %v1214_v16  ;;  %1855 = vmatprep.subr.mxu1 %v1214_v16 }
 0x10f   :  { %1757 = vmatpush3.msra.mxu0 %v1198_v1  ;;  %1871 = vmatpush3.msra.mxu1 %v1198_v1 }
 0x110   :  { %1758 = vmatprep.subr.mxu0 %v1213_v32  ;;  %1856 = vmatprep.subr.mxu1 %v1213_v32 }
 0x111   :  { %1759 = vmatpush3.msra.mxu0 %v1197_v34  ;;  %1872 = vmatpush3.msra.mxu1 %v1197_v34 }
 0x112   :  { %1760 = vmatprep.subr.mxu0 %v1212_v42  ;;  %1857 = vmatprep.subr.mxu1 %v1212_v42 }
 0x11e   :  { %v2678_v62 = vpop.f32.mrf.mxu0 }
 0x120   :  { %v2695_v15 = vpop.f32.mrf.mxu0 }
 0x124   :  { %v2706_v25 = vpop.f32.mrf.mxu0 }
 0x125   :  { %3101 = vst [vmem:[#allocation5_spill] sm:$0xff] %v2706_v25 }
 0x126   :  { %v2708_v26 = vpop.f32.mrf.mxu0 }
 0x127   :  { %3102 = vst [vmem:[#allocation6_spill] sm:$0xff] %v2708_v26 }
 0x129   :  { %v2710_v28 = vpop.f32.mrf.mxu0 }
 0x12a   :  { %3103 = vst [vmem:[#allocation7_spill] sm:$0xff] %v2710_v28 }
 0x12b   :  { %v2724_v36 = vpop.f32.mrf.mxu0 }
 0x12c   :  { %3104 = vst [vmem:[#allocation8_spill] sm:$0xff] %v2724_v36 }
 0x1a6   :  { %v1706_v44 = vpop.f32.mrf.mxu0 }
 0x1a8   :  { %v1707_v45 = vpop.f32.mrf.mxu0 }
 0x1a9   :  { %v2741_v51 = vadd.f32 %v1707_v45, %v1706_v44  ;;  %v1196_v44 = vld [vmem:[%s3096_s3] sm:$0xff]  ;;  %s1917_s3 = smov [#allocation2]  }
 0x1aa   :  { %v1709_v6 = vpop.f32.mrf.mxu0  ;;  %1761 = vmatpush3.msra.mxu0 %v1196_v44  ;;  %1873 = vmatpush3.msra.mxu1 %v1196_v44  ;;  %s1609_s22 = sshll.u32 %s1917_s3, 4  ;;  %s1610_s22 = int_to_ptr.vmem [resolvable:$true] %s1609_s22 }
 0x1ab   :  { %v953_v60 = vrot.slane %v2741_v51, 6  ;;  %v921_v0 = vrot.slane %v2741_v51, 5  ;;  %v841_v19 = vrot.slane %v2741_v51, 2  ;;  %v809_v22 = vrot.slane %v2741_v51, 1  ;;  %1831 = vmatprep.subr.mxu1 %v3099_v57  ;;  %p1894_p1 = scmp.lt.s32.totalorder %s1610_s22, %s1610_s22 }
 0x1ac   :  { %v1710_v5 = vpop.f32.mrf.mxu0  ;;  %v873_v39 = vrot.slane %v2741_v51, 3  ;;  %v985_v40 = vrot.slane %v2741_v51, 7 }
 0x1ad   :  { %961 = vrot.lane.b32.xlu1 %v953_v60, %s1912_s7  ;;  %929 = vrot.lane.b32.xlu0 %v921_v0, %s1913_s8  ;;  %v2778_v38 = vadd.f32 %v1710_v5, %v1709_v6 }
 0x1ae   :  { %v1712_v45 = vpop.f32.mrf.mxu0 }
 0x1af   :  { %v810_v21 = vrot.slane %v2778_v38, 1  ;;  %v922_v53 = vrot.slane %v2778_v38, 5  ;;  %v842_v60 = vrot.slane %v2778_v38, 2  ;;  %v954_v0 = vrot.slane %v2778_v38, 6 }
 0x1b0   :  { %v1713_v54 = vpop.f32.mrf.mxu0  ;;  %v874_v8 = vrot.slane %v2778_v38, 3  ;;  %v986_v11 = vrot.slane %v2778_v38, 7 }
 0x1b1   :  { %849 = vrot.lane.b32.xlu1 %v841_v19, %s1912_s7  ;;  %817 = vrot.lane.b32.xlu0 %v809_v22, %s1913_s8  ;;  %v2799_v6 = vadd.f32 %v1713_v54, %v1712_v45 }
 0x1b2   :  { %v1715_v4 = vpop.f32.mrf.mxu0 }
 0x1b3   :  { %v811_v19 = vrot.slane %v2799_v6, 1  ;;  %v923_v22 = vrot.slane %v2799_v6, 5  ;;  %v843_v5 = vrot.slane %v2799_v6, 2  ;;  %v955_v32 = vrot.slane %v2799_v6, 6 }
 0x1b4   :  { %v1716_v16 = vpop.f32.mrf.mxu0  ;;  %v987_v42 = vrot.slane %v2799_v6, 7 }
 0x1b5   :  { %881 = vrot.lane.b32.xlu1 %v873_v39, %s1914_s21  ;;  %993 = vrot.lane.b32.xlu0 %v985_v40, %s1914_s21  ;;  %v2813_v39 = vadd.f32 %v1716_v16, %v1715_v4  ;;  %v875_v40 = vrot.slane %v2799_v6, 3 }
 0x1b6   :  { %v1718_v1 = vpop.f32.mrf.mxu0 }
 0x1b7   :  { %v812_v4 = vrot.slane %v2813_v39, 1 }
 0x1b8   :  { %v1719_v34 = vpop.f32.mrf.mxu0 }
 0x1b9   :  { %819 = vrot.lane.b32.xlu1 %v810_v21, %s1913_s8  ;;  %931 = vrot.lane.b32.xlu0 %v922_v53, %s1913_s8  ;;  %v2819_v45 = vadd.f32 %v1719_v34, %v1718_v1  ;;  %v876_v21 = vrot.slane %v2813_v39, 3  ;;  %v924_v53 = vrot.slane %v2813_v39, 5  ;;  %v988_v1 = vrot.slane %v2813_v39, 7 }
 0x1ba   :  { %v1721_v44 = vpop.f32.mrf.mxu0 }
 0x1bb   :  { %v925_v34 = vrot.slane %v2819_v45, 5 }
 0x1bc   :  { %v1722_v54 = vpop.f32.mrf.mxu0 }
 0x1bd   :  { %851 = vrot.lane.b32.xlu1 %v842_v60, %s1912_s7  ;;  %963 = vrot.lane.b32.xlu0 %v954_v0, %s1912_s7  ;;  %v2825_v60 = vadd.f32 %v1722_v54, %v1721_v44  ;;  %v877_v0 = vrot.slane %v2819_v45, 3  ;;  %v957_v54 = vrot.slane %v2819_v45, 6 }
 0x1bf   :  { %v958_v16 = vrot.slane %v2825_v60, 6  ;;  %v878_v44 = vrot.slane %v2825_v60, 3 }
 0x1c1   :  { %883 = vrot.lane.b32.xlu1 %v874_v8, %s1914_s21  ;;  %995 = vrot.lane.b32.xlu0 %v986_v11, %s1914_s21  ;;  %v814_v8 = vrot.slane %v2825_v60, 1  ;;  %v956_v11 = vrot.slane %v2813_v39, 6 }
 0x1c5   :  { %821 = vrot.lane.b32.xlu1 %v811_v19, %s1913_s8  ;;  %933 = vrot.lane.b32.xlu0 %v923_v22, %s1913_s8  ;;  %v844_v19 = vrot.slane %v2813_v39, 2  ;;  %v846_v22 = vrot.slane %v2825_v60, 2 }
 0x1c9   :  { %853 = vrot.lane.b32.xlu1 %v843_v5, %s1912_s7  ;;  %965 = vrot.lane.b32.xlu0 %v955_v32, %s1912_s7  ;;  %v1724_v5 = vpop.f32.mrf.mxu0  ;;  %v990_v32 = vrot.slane %v2825_v60, 7 }
 0x1cd   :  { %885 = vrot.lane.b32.xlu1 %v875_v40, %s1914_s21  ;;  %997 = vrot.lane.b32.xlu0 %v987_v42, %s1914_s21  ;;  %v1725_v40 = vpop.f32.mrf.mxu0 }
 0x1ce   :  { %v2847_v42 = vadd.f32 %v1725_v40, %v1724_v5 }
 0x1d1   :  { %887 = vrot.lane.b32.xlu1 %v876_v21, %s1914_s21  ;;  %935 = vrot.lane.b32.xlu0 %v924_v53, %s1913_s8  ;;  %v813_v21 = vrot.slane %v2819_v45, 1  ;;  %v815_v53 = vrot.slane %v2847_v42, 1 }
 0x1d5   :  { %889 = vrot.lane.b32.xlu1 %v877_v0, %s1914_s21  ;;  %823 = vrot.lane.b32.xlu0 %v812_v4, %s1913_s8  ;;  %v959_v0 = vrot.slane %v2847_v42, 6  ;;  %v845_v4 = vrot.slane %v2819_v45, 2 }
 0x1d9   :  { %827 = vrot.lane.b32.xlu1 %v814_v8, %s1913_s8  ;;  %967 = vrot.lane.b32.xlu0 %v956_v11, %s1912_s7  ;;  %v847_v8 = vrot.slane %v2847_v42, 2  ;;  %v989_v11 = vrot.slane %v2819_v45, 7 }
 0x1dd   :  { %971 = vrot.lane.b32.xlu1 %v958_v16, %s1912_s7  ;;  %855 = vrot.lane.b32.xlu0 %v844_v19, %s1912_s7  ;;  %v1727_v16 = vpop.f32.mrf.mxu0  ;;  %v991_v19 = vrot.slane %v2847_v42, 7 }
 0x1e1   :  { %859 = vrot.lane.b32.xlu1 %v846_v22, %s1912_s7  ;;  %999 = vrot.lane.b32.xlu0 %v988_v1, %s1914_s21  ;;  %v926_v22 = vrot.slane %v2825_v60, 5  ;;  %v1728_v1 = vpop.f32.mrf.mxu0 }
 0x1e2   :  { %v2869_v5 = vadd.f32 %v1728_v1, %v1727_v16  ;;  %v1884_v16 = vld [vmem:[%s3093_s0 + $0x18] sm:$0xff]  ;;  %v1887_v1 = vld [vmem:[%s3093_s0 + $0x30] sm:$0xff] }
 0x1e4   :  { %v816_v40 = vrot.slane %v2869_v5, 1 }
 0x1e5   :  { %1003 = vrot.lane.b32.xlu1 %v990_v32, %s1914_s21  ;;  %937 = vrot.lane.b32.xlu0 %v925_v34, %s1913_s8  ;;  %v879_v32 = vrot.slane %v2847_v42, 3  ;;  %v927_v34 = vrot.slane %v2847_v42, 5 }
 0x1e9   :  { %891 = vrot.lane.b32.xlu1 %v878_v44, %s1914_s21  ;;  %825 = vrot.lane.b32.xlu0 %v813_v21, %s1913_s8  ;;  %v928_v44 = vrot.slane %v2869_v5, 5  ;;  %v848_v21 = vrot.slane %v2869_v5, 2 }
 0x1ed   :  { %829 = vrot.lane.b32.xlu1 %v815_v53, %s1913_s8  ;;  %969 = vrot.lane.b32.xlu0 %v957_v54, %s1912_s7  ;;  %v960_v53 = vrot.slane %v2869_v5, 6  ;;  %v880_v54 = vrot.slane %v2869_v5, 3 }
 0x1f1   :  { %973 = vrot.lane.b32.xlu1 %v959_v0, %s1912_s7  ;;  %857 = vrot.lane.b32.xlu0 %v845_v4, %s1912_s7  ;;  %v992_v0 = vrot.slane %v2869_v5, 7  ;;  %v1881_v4 = vld [vmem:[%s3093_s0 + $0x8] sm:$0xff] }
 0x1f5   :  { %861 = vrot.lane.b32.xlu1 %v847_v8, %s1912_s7  ;;  %1001 = vrot.lane.b32.xlu0 %v989_v11, %s1914_s21  ;;  %v1882_v8 = vld [vmem:[%s3093_s0] sm:$0xff]  ;;  %v1883_v11 = vld [vmem:[%s3093_s0 + $0x10] sm:$0xff] }
 0x1f9   :  { %1005 = vrot.lane.b32.xlu1 %v991_v19, %s1914_s21  ;;  %939 = vrot.lane.b32.xlu0 %v926_v22, %s1913_s8  ;;  %v1885_v19 = vld [vmem:[%s3093_s0 + $0x20] sm:$0xff]  ;;  %v1886_v22 = vld [vmem:[%s3093_s0 + $0x28] sm:$0xff] }
 0x1fd   :  { %893 = vrot.lane.b32.xlu1 %v879_v32, %s1914_s21  ;;  %941 = vrot.lane.b32.xlu0 %v927_v34, %s1913_s8  ;;  %v1888_v32 = vld [vmem:[%s3093_s0 + $0x38] sm:$0xff]  ;;  %v1068_v34 = vlaneseq }
 0x201   :  { %831 = vrot.lane.b32.xlu1 %v816_v40, %s1913_s8  ;;  %943 = vrot.lane.b32.xlu0 %v928_v44, %s1913_s8 }
 0x205   :  { %863 = vrot.lane.b32.xlu1 %v848_v21, %s1912_s7  ;;  %975 = vrot.lane.b32.xlu0 %v960_v53, %s1912_s7  ;;  %v1069_v21 = vshrl.u32 %v1068_v34, 7  ;;  %v905_v53 = vrot.slane %v2741_v51, 4 }
 0x209   :  { %895 = vrot.lane.b32.xlu1 %v880_v54, %s1914_s21  ;;  %1007 = vrot.lane.b32.xlu0 %v992_v0, %s1914_s21 }
 0x20d   :  { %1356 = vrot.lane.b32.xlu1 %v1881_v4, %s1915_s23  ;;  %1354 = vrot.lane.b32.xlu0 %v1882_v8, %s1915_s23 }
 0x211   :  { %1358 = vrot.lane.b32.xlu0 %v1883_v11, %s1915_s23  ;;  %1360 = vrot.lane.b32.xlu1 %v1884_v16, %s1915_s23  ;;  %v2915_v11 = vsub.s32 0, %v1069_v21  ;;  %v649_v16 = vpop.f32.mrf.mxu1 }
 0x215   :  { %1362 = vrot.lane.b32.xlu0 %v1885_v19, %s1915_s23  ;;  %1364 = vrot.lane.b32.xlu1 %v1886_v22, %s1915_s23 }
 0x219   :  { %1366 = vrot.lane.b32.xlu0 %v1887_v1, %s1915_s23  ;;  %1368 = vrot.lane.b32.xlu1 %v1888_v32, %s1915_s23  ;;  %s1889_s23 = scalar_lea.vmem %s1610_s22, 128 }
 0x21a   :  { %p1890_p0 = scmp.ne.s32.totalorder %s1610_s22, %s1889_s23  ;;  %p1895_p2 = scmp.lt.s32.totalorder %s1889_s23, %s1889_s23 }
 0x21c   :  { %p1896_p3 = por %p1895_p2, %p1894_p1 }
 0x21e   :  { %p1897_p4 = pnand %p1896_p3, %p1890_p0 }
 0x21f   :  { %v962_v40 = vpop.permute.xlu1 %961  ;;  %v930_v44 = vpop.permute.xlu0 %929 }
 0x220   :  { %v1044_v4 = vsel %vm1017_vm1, %v905_v53, %v930_v44 }
 0x221   :  { %v1052_v1 = vsel %vm1026_vm2, %v1044_v4, %v962_v40 }
 0x223   :  { %v850_v54 = vpop.permute.xlu1 %849  ;;  %v818_v0 = vpop.permute.xlu0 %817 }
 0x224   :  { %v1018_v8 = vsel %vm1017_vm1, %v2741_v51, %v818_v0  ;;  %v651_v51 = vpop.f32.mrf.mxu1 }
 0x225   :  { %v1027_v22 = vsel %vm1026_vm2, %v1018_v8, %v850_v54 }
 0x227   :  { %v882_v19 = vpop.permute.xlu1 %881  ;;  %v994_v32 = vpop.permute.xlu0 %993 }
 0x228   :  { %v1036_v34 = vsel %vm1035_vm3, %v1027_v22, %v882_v19  ;;  %v1060_v57 = vsel %vm1035_vm3, %v1052_v1, %v994_v32  ;;  %v906_v19 = vrot.slane %v2778_v38, 4 }
 0x229   :  { %v1071_v44 = vrot.slane %v1036_v34, %v2915_v11  ;;  %v1075_v53 = vrot.slane %v1060_v57, %v2915_v11  ;;  %v655_v57 = vpop.f32.mrf.mxu1 }
 0x22b   :  { %v1132_v0 = vsub.f32 %v1071_v44, %v649_v16  ;;  %v1133_v28 = vsub.f32 %v1075_v53, %v651_v51  ;;  %v820_v21 = vpop.permute.xlu1 %819  ;;  %v932_v36 = vpop.permute.xlu0 %931 }
 0x22c   :  { %v1019_v16 = vsel %vm1017_vm1, %v2778_v38, %v820_v21  ;;  %v1045_v32 = vsel %vm1017_vm1, %v906_v19, %v932_v36  ;;  %v907_v19 = vrot.slane %v2799_v6, 4 }
 0x22d   :  { %v1148_v25 = vadd.f32 %v1132_v0, %v2561_v59  ;;  %v1149_v54 = vadd.f32 %v1133_v28, %v2558_v56 }
 0x22f   :  { %v1164_v8 = vmax.f32 %v1148_v25, 0.0  ;;  %v852_v40 = vpop.permute.xlu1 %851  ;;  %v964_v4 = vpop.permute.xlu0 %963  ;;  %v1165_v26 = vmax.f32 %v1149_v54, 0.0 }
 0x230   :  { %v1028_v59 = vsel %vm1026_vm2, %v1019_v16, %v852_v40  ;;  %v1053_v56 = vsel %vm1026_vm2, %v1045_v32, %v964_v4 }
 0x231   :  { %v1180_v22 = vmul.f32 %v1164_v8, %v2550_v49  ;;  %v1181_v1 = vmul.f32 %v1165_v26, %v2553_v52  ;;  %v657_v26 = vpop.f32.mrf.mxu1 }
 0x233   :  { %v884_v25 = vpop.permute.xlu1 %883  ;;  %1292 = vmatprep.mubr.f32.mxu0 %v1181_v1  ;;  %v996_v28 = vpop.permute.xlu0 %995 }
 0x234   :  { %v1037_v34 = vsel %vm1035_vm3, %v1028_v59, %v884_v25  ;;  %v1061_v44 = vsel %vm1035_vm3, %v1053_v56, %v996_v28  ;;  %1293 = vmatmul.mubr.f32.vlgmr.msra.gmra.mxu0 %v1180_v22  ;;  %v661_v16 = vpop.f32.mrf.mxu1 }
 0x235   :  { %v1079_v49 = vrot.slane %v1037_v34, %v2915_v11  ;;  %v1083_v52 = vrot.slane %v1061_v44, %v2915_v11 }
 0x236   :  { %v663_v34 = vpop.f32.mrf.mxu1 }
 0x237   :  { %v1134_v38 = vsub.f32 %v1079_v49, %v655_v57  ;;  %v1135_v53 = vsub.f32 %v1083_v52, %v657_v26  ;;  %v822_v36 = vpop.permute.xlu1 %821  ;;  %v934_v51 = vpop.permute.xlu0 %933 }
 0x238   :  { %v1020_v57 = vsel %vm1017_vm1, %v2799_v6, %v822_v36  ;;  %v1046_v32 = vsel %vm1017_vm1, %v907_v19, %v934_v51 }
 0x239   :  { %v1151_v0 = vadd.f32 %v1135_v53, %v2574_v3  ;;  %v1150_v21 = vadd.f32 %v1134_v38, %v2568_v63 }
 0x23b   :  { %v854_v54 = vpop.permute.xlu1 %853  ;;  %v966_v8 = vpop.permute.xlu0 %965  ;;  %v1167_v40 = vmax.f32 %v1151_v0, 0.0  ;;  %v1166_v4 = vmax.f32 %v1150_v21, 0.0 }
 0x23c   :  { %v1029_v3 = vsel %vm1026_vm2, %v1020_v57, %v854_v54  ;;  %v1054_v63 = vsel %vm1026_vm2, %v1046_v32, %v966_v8 }
 0x23d   :  { %v1183_v22 = vmul.f32 %v1167_v40, %v2563_v61  ;;  %v1182_v1 = vmul.f32 %v1166_v4, %v2556_v55 }
 0x23f   :  { %v886_v59 = vpop.permute.xlu1 %885  ;;  %1297 = vmatprep.mubr.f32.mxu0 %v1183_v22  ;;  %v998_v56 = vpop.permute.xlu0 %997 }
 0x240   :  { %v1038_v25 = vsel %vm1035_vm3, %v1029_v3, %v886_v59  ;;  %v1062_v28 = vsel %vm1035_vm3, %v1054_v63, %v998_v56  ;;  %1298 = vmatmul.mubr.f32.gmra.mxu0 %v1182_v1 }
 0x241   :  { %v1087_v55 = vrot.slane %v1038_v25, %v2915_v11  ;;  %v1091_v61 = vrot.slane %v1062_v28, %v2915_v11 }
 0x243   :  { %v1136_v6 = vsub.f32 %v1087_v55, %v661_v16  ;;  %v1137_v44 = vsub.f32 %v1091_v61, %v663_v34  ;;  %v888_v49 = vpop.permute.xlu1 %887  ;;  %v936_v52 = vpop.permute.xlu0 %935 }
 0x244   :  { %v667_v16 = vpop.f32.mrf.mxu1 }
 0x245   :  { %v1153_v26 = vadd.f32 %v1137_v44, %v2588_v14  ;;  %v1152_v38 = vadd.f32 %v1136_v6, %v2584_v10  ;;  %v908_v14 = vrot.slane %v2813_v39, 4 }
 0x246   :  { %v669_v25 = vpop.f32.mrf.mxu1 }
 0x247   :  { %v890_v53 = vpop.permute.xlu1 %889  ;;  %v824_v36 = vpop.permute.xlu0 %823  ;;  %v1169_v51 = vmax.f32 %v1153_v26, 0.0  ;;  %v1168_v0 = vmax.f32 %v1152_v38, 0.0 }
 0x248   :  { %v1021_v4 = vsel %vm1017_vm1, %v2813_v39, %v824_v36 }
 0x249   :  { %v1185_v21 = vmul.f32 %v1169_v51, %v2577_v7  ;;  %v1184_v54 = vmul.f32 %v1168_v0, %v2572_v2  ;;  %v1047_v7 = vsel %vm1017_vm1, %v908_v14, %v936_v52  ;;  %v673_v0 = vpop.f32.mrf.mxu1 }
 0x24b   :  { %v828_v8 = vpop.permute.xlu1 %827  ;;  %1302 = vmatprep.mubr.f32.mxu0 %v1185_v21  ;;  %v968_v40 = vpop.permute.xlu0 %967 }
 0x24c   :  { %1303 = vmatmul.mubr.f32.gmra.mxu0 %v1184_v54  ;;  %v1055_v57 = vsel %vm1026_vm2, %v1047_v7, %v968_v40  ;;  %v675_v14 = vpop.f32.mrf.mxu1 }
 0x24f   :  { %v972_v19 = vpop.permute.xlu1 %971  ;;  %v856_v22 = vpop.permute.xlu0 %855 }
 0x250   :  { %v1030_v10 = vsel %vm1026_vm2, %v1021_v4, %v856_v22  ;;  %v909_v4 = vrot.slane %v2819_v45, 4 }
 0x251   :  { %v1039_v1 = vsel %vm1035_vm3, %v1030_v10, %v888_v49 }
 0x252   :  { %v1095_v2 = vrot.slane %v1039_v1, %v2915_v11 }
 0x253   :  { %v860_v32 = vpop.permute.xlu1 %859  ;;  %v1000_v3 = vpop.permute.xlu0 %999 }
 0x254   :  { %v1138_v63 = vsub.f32 %v1095_v2, %v667_v16  ;;  %v1063_v59 = vsel %vm1035_vm3, %v1055_v57, %v1000_v3  ;;  %v679_v3 = vpop.f32.mrf.mxu1 }
 0x255   :  { %v1099_v56 = vrot.slane %v1063_v59, %v2915_v11 }
 0x256   :  { %v1154_v39 = vadd.f32 %v1138_v63, %v2598_v20  ;;  %v1023_v20 = vsel %vm1017_vm1, %v2825_v60, %v828_v8  ;;  %v910_v63 = vrot.slane %v2825_v60, 4  ;;  %v911_v60 = vrot.slane %v2847_v42, 4 }
 0x257   :  { %v1139_v28 = vsub.f32 %v1099_v56, %v669_v25  ;;  %v1004_v55 = vpop.permute.xlu1 %1003  ;;  %v938_v61 = vpop.permute.xlu0 %937  ;;  %v1032_v40 = vsel %vm1026_vm2, %v1023_v20, %v860_v32 }
 0x258   :  { %v1170_v6 = vmax.f32 %v1154_v39, 0.0  ;;  %v1048_v10 = vsel %vm1017_vm1, %v909_v4, %v938_v61 }
 0x259   :  { %v1155_v34 = vadd.f32 %v1139_v28, %v2602_v24 }
 0x25a   :  { %v1186_v38 = vmul.f32 %v1170_v6, %v2586_v12  ;;  %v681_v6 = vpop.f32.mrf.mxu1 }
 0x25b   :  { %v892_v44 = vpop.permute.xlu1 %891  ;;  %v826_v49 = vpop.permute.xlu0 %825  ;;  %v1171_v52 = vmax.f32 %v1155_v34, 0.0 }
 0x25c   :  { %v1022_v21 = vsel %vm1017_vm1, %v2819_v45, %v826_v49  ;;  %v1041_v12 = vsel %vm1035_vm3, %v1032_v40, %v892_v44  ;;  %v685_v20 = vpop.f32.mrf.mxu1 }
 0x25d   :  { %v1187_v26 = vmul.f32 %v1171_v52, %v2591_v18  ;;  %v1111_v2 = vrot.slane %v1041_v12, %v2915_v11 }
 0x25f   :  { %v830_v36 = vpop.permute.xlu1 %829  ;;  %1307 = vmatprep.mubr.f32.mxu0 %v1187_v26  ;;  %v970_v51 = vpop.permute.xlu0 %969  ;;  %v1142_v39 = vsub.f32 %v1111_v2, %v679_v3 }
 0x260   :  { %1308 = vmatmul.mubr.f32.gmra.mxu0 %v1186_v38  ;;  %v1056_v1 = vsel %vm1026_vm2, %v1048_v10, %v970_v51  ;;  %v1024_v44 = vsel %vm1017_vm1, %v2847_v42, %v830_v36  ;;  %v687_v10 = vpop.f32.mrf.mxu1 }
 0x262   :  { %v691_v3 = vpop.f32.mrf.mxu1 }
 0x263   :  { %v974_v24 = vpop.permute.xlu1 %973  ;;  %v858_v54 = vpop.permute.xlu0 %857 }
 0x264   :  { %v1031_v18 = vsel %vm1026_vm2, %v1022_v21, %v858_v54 }
 0x265   :  { %v1040_v22 = vsel %vm1035_vm3, %v1031_v18, %v890_v53 }
 0x266   :  { %v1103_v8 = vrot.slane %v1040_v22, %v2915_v11 }
 0x267   :  { %v862_v16 = vpop.permute.xlu1 %861  ;;  %v1002_v7 = vpop.permute.xlu0 %1001 }
 0x268   :  { %v1140_v57 = vsub.f32 %v1103_v8, %v673_v0  ;;  %v1064_v45 = vsel %vm1035_vm3, %v1056_v1, %v1002_v7 }
 0x269   :  { %v1107_v32 = vrot.slane %v1064_v45, %v2915_v11  ;;  %v912_v45 = vrot.slane %v2869_v5, 4 }
 0x26a   :  { %v1156_v53 = vadd.f32 %v1140_v57, %v2610_v29  ;;  %v1033_v29 = vsel %vm1026_vm2, %v1024_v44, %v862_v16 }
 0x26b   :  { %v1141_v59 = vsub.f32 %v1107_v32, %v675_v14  ;;  %v1006_v56 = vpop.permute.xlu1 %1005  ;;  %v940_v25 = vpop.permute.xlu0 %939 }
 0x26c   :  { %v1049_v28 = vsel %vm1017_vm1, %v910_v63, %v940_v25  ;;  %v1172_v52 = vmax.f32 %v1156_v53, 0.0 }
 0x26d   :  { %v1057_v61 = vsel %vm1026_vm2, %v1049_v28, %v972_v19  ;;  %v1157_v34 = vadd.f32 %v1141_v59, %v2616_v31  ;;  %v1158_v19 = vadd.f32 %v1142_v39, %v2624_v35 }
 0x26e   :  { %v1065_v49 = vsel %vm1035_vm3, %v1057_v61, %v1004_v55  ;;  %v1188_v4 = vmul.f32 %v1172_v52, %v2600_v23  ;;  %v693_v61 = vpop.f32.mrf.mxu1 }
 0x26f   :  { %v1115_v26 = vrot.slane %v1065_v49, %v2915_v11  ;;  %v894_v38 = vpop.permute.xlu1 %893  ;;  %v942_v51 = vpop.permute.xlu0 %941  ;;  %v1173_v0 = vmax.f32 %v1157_v34, 0.0  ;;  %v1174_v8 = vmax.f32 %v1158_v19, 0.0 }
 0x270   :  { %v1042_v31 = vsel %vm1035_vm3, %v1033_v29, %v894_v38  ;;  %v1050_v21 = vsel %vm1017_vm1, %v911_v60, %v942_v51 }
 0x271   :  { %v1119_v36 = vrot.slane %v1042_v31, %v2915_v11  ;;  %v1058_v55 = vsel %vm1026_vm2, %v1050_v21, %v974_v24  ;;  %v1189_v42 = vmul.f32 %v1173_v0, %v2605_v27  ;;  %v1143_v54 = vsub.f32 %v1115_v26, %v681_v6 }
 0x272   :  { %v1066_v40 = vsel %vm1035_vm3, %v1058_v55, %v1006_v56  ;;  %v1190_v57 = vmul.f32 %v1174_v8, %v2614_v30 }
 0x273   :  { %v1144_v18 = vsub.f32 %v1119_v36, %v685_v20  ;;  %v1123_v12 = vrot.slane %v1066_v40, %v2915_v11  ;;  %v832_v22 = vpop.permute.xlu1 %831  ;;  %1312 = vmatprep.mubr.f32.mxu0 %v1189_v42  ;;  %v944_v35 = vpop.permute.xlu0 %943  ;;  %v1159_v14 = vadd.f32 %v1143_v54, %v2630_v9  ;;  %v3105_v54 = vmov 0.0   ;;  %v1501_v40 = vld [vmem:[%s3097_s4 + $0x10] sm:$0xff] }
 0x274   :  { %1313 = vmatmul.mubr.f32.gmra.mxu0 %v1188_v4  ;;  %v1025_v63 = vsel %vm1017_vm1, %v2869_v5, %v832_v22  ;;  %v1051_v53 = vsel %vm1017_vm1, %v912_v45, %v944_v35  ;;  %v1500_v4 = vld [vmem:[%s3097_s4 + $0x8] sm:$0xff] }
 0x275   :  { %v1175_v1 = vmax.f32 %v1159_v14, 0.0  ;;  %v1145_v24 = vsub.f32 %v1123_v12, %v687_v10  ;;  %v1160_v27 = vadd.f32 %v1144_v18, %v2640_v41  ;;  %v1499_v18 = vld [vmem:[%s3097_s4] sm:$0xff] }
 0x277   :  { %v864_v16 = vpop.permute.xlu1 %863  ;;  %v976_v7 = vpop.permute.xlu0 %975  ;;  %v1191_v2 = vmul.f32 %v1175_v1, %v2619_v33  ;;  %v1161_v23 = vadd.f32 %v1145_v24, %v2644_v17  ;;  %v1176_v32 = vmax.f32 %v1160_v27, 0.0 }
 0x278   :  { %v1034_v41 = vsel %vm1026_vm2, %v1025_v63, %v864_v16  ;;  %v1059_v33 = vsel %vm1026_vm2, %v1051_v53, %v976_v7  ;;  %v3056_v53 = vld [vmem:[%s3097_s4 + $0x28] ss:$0 sm:$0xff]  ;;  %vm1522_vm2 = vcmask 1044484  }
 0x279   :  { %1317 = vmatprep.mubr.f32.mxu1 %v1191_v2  ;;  %v1177_v9 = vmax.f32 %v1161_v23, 0.0  ;;  %v1192_v39 = vmul.f32 %v1176_v32, %v2628_v37 }
 0x27a   :  { %1318 = vmatmul.mubr.f32.vlgmr.msra.gmra.mxu1 %v1190_v57 }
 0x27b   :  { %v896_v59 = vpop.permute.xlu1 %895  ;;  %v1008_v17 = vpop.permute.xlu0 %1007  ;;  %v1193_v30 = vmul.f32 %v1177_v9, %v2633_v13 }
 0x27c   :  { %v1043_v56 = vsel %vm1035_vm3, %v1034_v41, %v896_v59  ;;  %v1067_v25 = vsel %vm1035_vm3, %v1059_v33, %v1008_v17  ;;  %vm1524_vm3 = vcmask 1045509  }
 0x27d   :  { %v1127_v28 = vrot.slane %v1043_v56, %v2915_v11  ;;  %v1131_v5 = vrot.slane %v1067_v25, %v2915_v11  ;;  %1322 = vmatprep.mubr.f32.mxu1 %v1193_v30  ;;  %v3106_v25 = vld [vmem:[#allocation6_spill] sm:$0xff] }
 0x27e   :  { %1323 = vmatmul.mubr.f32.gmra.mxu1 %v1192_v39 }
 0x27f   :  { %v1146_v34 = vsub.f32 %v1127_v28, %v691_v3  ;;  %v1147_v6 = vsub.f32 %v1131_v5, %v693_v61  ;;  %v1357_v44 = vpop.permute.xlu1 %1356  ;;  %v1355_v49 = vpop.permute.xlu0 %1354 }
 0x280   :  { %v1382_v13 = vsel %vm1378_vm4, %v1357_v44, 0.0  ;;  %v1379_v60 = vsel %vm1378_vm4, %v1355_v49, 0.0 }
 0x281   :  { %1383 = vadd.xlane.f32.xlu1 %v1382_v13  ;;  %1380 = vadd.xlane.f32.xlu0 %v1379_v60  ;;  %v1163_v37 = vadd.f32 %v1147_v6, %v2656_v48  ;;  %v1162_v52 = vadd.f32 %v1146_v34, %v2654_v47 }
 0x283   :  { %v1179_v29 = vmax.f32 %v1163_v37, 0.0  ;;  %v1178_v11 = vmax.f32 %v1162_v52, 0.0  ;;  %v1359_v26 = vpop.permute.xlu0 %1358  ;;  %v1361_v38 = vpop.permute.xlu1 %1360 }
 0x284   :  { %v1385_v51 = vsel %vm1378_vm4, %v1359_v26, 0.0  ;;  %v1388_v19 = vsel %vm1378_vm4, %v1361_v38, 0.0 }
 0x285   :  { %v1195_v0 = vmul.f32 %v1179_v29, %v2647_v46  ;;  %v1194_v20 = vmul.f32 %v1178_v11, %v2642_v43  ;;  %1386 = vadd.xlane.f32.xlu0 %v1385_v51  ;;  %v1502_v46 = vld [vmem:[%s3097_s4 + $0x18] sm:$0xff] }
 0x286   :  { %1832 = vmatpush3.msra.mxu1 %v1502_v46 }
 0x287   :  { %1327 = vmatprep.mubr.f32.mxu1 %v1195_v0  ;;  %v1363_v31 = vpop.permute.xlu0 %1362  ;;  %v1365_v21 = vpop.permute.xlu1 %1364  ;;  %1833 = vmatprep.subr.mxu1 %v3105_v54 }
 0x288   :  { %1328 = vmatmul.mubr.f32.gmra.mxu1 %v1194_v20  ;;  %v1391_v48 = vsel %vm1378_vm4, %v1363_v31, 0.0  ;;  %v1394_v47 = vsel %vm1378_vm4, %v1365_v21, 0.0  ;;  %v3107_v31 = vld [vmem:[#allocation5_spill] sm:$0xff] }
 0x289   :  { %1389 = vadd.xlane.f32.xlu0 %v1388_v19  ;;  %1392 = vadd.xlane.f32.xlu1 %v1391_v48 }
 0x28a   :  { %1834 = vmatpush3.msra.mxu1 %v1501_v40  ;;  %1839 = vmatprep.mubr.msk.f32.mxu1 %vm1916_vm5, %v3105_v54  ;;  %vm1528_vm5 = vcmask 1047559  }
 0x28b   :  { %v1367_v36 = vpop.permute.xlu0 %1366  ;;  %v1369_v55 = vpop.permute.xlu1 %1368  ;;  %1835 = vmatprep.subr.mxu1 %v3105_v54 }
 0x28c   :  { %v1397_v42 = vsel %vm1378_vm4, %v1367_v36, 0.0  ;;  %v1400_v43 = vsel %vm1378_vm4, %v1369_v55, 0.0  ;;  %1836 = vmatpush3.msra.mxu1 %v1500_v4  ;;  %vm1526_vm4 = vcmask 1046534  }
 0x28d   :  { %1395 = vadd.xlane.f32.xlu0 %v1394_v47  ;;  %1398 = vadd.xlane.f32.xlu1 %v1397_v42 }
 0x28e   :  { %1837 = vmatprep.subr.mxu1 %v3105_v54 }
 0x28f   :  { %1838 = vmatpush3.msra.mxu1 %v1499_v18 }
 0x291   :  { %1401 = vadd.xlane.f32.xlu0 %v1400_v43 }
 0x2f4   :  { %v1762_v12 = vpop.f32.mrf.mxu0 }
 0x2f6   :  { %v1763_v22 = vpop.f32.mrf.mxu0 }
 0x2f7   :  { %v1764_v2 = vadd.f32 %v1763_v22, %v1762_v12  ;;  %v3108_v12 = vld [vmem:[#allocation8_spill] sm:$0xff] }
 0x2f9   :  { %v1334_v9 = vadd.f32 %v1764_v2, %v2673_v58 }
 0x300   :  { %v1765_v35 = vpop.f32.mrf.mxu0 }
 0x302   :  { %v1766_v14 = vpop.f32.mrf.mxu0 }
 0x303   :  { %v1767_v27 = vadd.f32 %v1766_v14, %v1765_v35 }
 0x305   :  { %v1335_v57 = vadd.f32 %v2662_v50, %v1767_v27 }
 0x307   :  { %v1347_v33 = vadd.f32 %v3056_v53, %v1335_v57 }
 0x309   :  { %v1404_v28 = vmax.f32 %v1347_v33, 0.0 }
 0x30a   :  { %v1381_v16 = vpop.xlane.xlu0 %1380  ;;  %v1384_v3 = vpop.xlane.xlu1 %1383 }
 0x30b   :  { %vm1412_vm6 = vcmp.gt.f32.partialorder %v1384_v3, 0.0  ;;  %vm1411_vm7 = vcmp.gt.f32.partialorder %v1381_v16, 0.0 }
 0x30c   :  { %v1768_v10 = vpop.f32.mrf.mxu0  ;;  %v1643_v56 = vsel %vm1412_vm6, 1.0, %v3105_v54  ;;  %v1642_v5 = vsel %vm1411_vm7, 1.0, %v3105_v54 }
 0x30d   :  { %v1436_v60 = vmul.f32 %v1643_v56, %v1404_v28  ;;  %v3109_v28 = vld [vmem:[#allocation7_spill] sm:$0xff] }
 0x30e   :  { %v1769_v8 = vpop.f32.mrf.mxu0  ;;  %v1387_v32 = vpop.xlane.xlu0 %1386 }
 0x30f   :  { %v1770_v7 = vadd.f32 %v1769_v8, %v1768_v10  ;;  %vm1413_vm8 = vcmp.gt.f32.partialorder %v1387_v32, 0.0  ;;  %v1450_v55 = vsel %vm1017_vm1, %v1436_v60, 0.0 }
 0x310   :  { %v1644_v44 = vsel %vm1413_vm8, 1.0, %v3105_v54  ;;  %v1451_v14 = vrot.slane %v1450_v55, 4 }
 0x311   :  { %v1336_v45 = vadd.f32 %v1770_v7, %v2695_v15  ;;  %v1346_v15 = vadd.f32 %v3056_v53, %v1334_v9 }
 0x312   :  { %v1390_v50 = vpop.xlane.xlu0 %1389 }
 0x313   :  { %v1348_v59 = vadd.f32 %v3056_v53, %v1336_v45  ;;  %vm1414_vm9 = vcmp.gt.f32.partialorder %v1390_v50, 0.0  ;;  %v1403_v6 = vmax.f32 %v1346_v15, 0.0  ;;  %v1452_v45 = vadd.f32 %v1451_v14, %v1450_v55 }
 0x314   :  { %v1645_v37 = vsel %vm1414_vm9, 1.0, %v3105_v54 }
 0x315   :  { %v1405_v61 = vmax.f32 %v1348_v59, 0.0  ;;  %v1435_v11 = vmul.f32 %v1642_v5, %v1403_v6 }
 0x316   :  { %v1396_v29 = vpop.xlane.xlu0 %1395 }
 0x317   :  { %v1437_v0 = vmul.f32 %v1644_v44, %v1405_v61  ;;  %vm1416_vm11 = vcmp.gt.f32.partialorder %v1396_v29, 0.0  ;;  %v1443_v42 = vsel %vm1017_vm1, %v1435_v11, 0.0 }
 0x318   :  { %v1647_v4 = vsel %vm1416_vm11, 1.0, %v3105_v54  ;;  %v1444_v10 = vrot.slane %v1443_v42, 4 }
 0x319   :  { %v1457_v40 = vsel %vm1017_vm1, %v1437_v0, 0.0 }
 0x31a   :  { %v1445_v32 = vadd.f32 %v1444_v10, %v1443_v42  ;;  %v1402_v50 = vpop.xlane.xlu0 %1401 }
 0x31b   :  { %vm1418_vm13 = vcmp.gt.f32.partialorder %v1402_v50, 0.0 }
 0x320   :  { %v1771_v1 = vpop.f32.mrf.mxu0 }
 0x322   :  { %v1772_v24 = vpop.f32.mrf.mxu0 }
 0x323   :  { %v1773_v23 = vadd.f32 %v1772_v24, %v1771_v1  ;;  %v1458_v1 = vrot.slane %v1457_v40, 4 }
 0x325   :  { %v1337_v63 = vadd.f32 %v2678_v62, %v1773_v23  ;;  %v1393_v62 = vpop.xlane.xlu1 %1392 }
 0x326   :  { %vm1415_vm10 = vcmp.gt.f32.partialorder %v1393_v62, 0.0  ;;  %v1446_v62 = vrot.slane %v1445_v32, 2 }
 0x327   :  { %v1349_v58 = vadd.f32 %v3056_v53, %v1337_v63  ;;  %v1646_v51 = vsel %vm1415_vm10, 1.0, %v3105_v54  ;;  %v1459_v63 = vadd.f32 %v1458_v1, %v1457_v40 }
 0x329   :  { %v1406_v49 = vmax.f32 %v1349_v58, 0.0  ;;  %v1399_v36 = vpop.xlane.xlu1 %1398 }
 0x32a   :  { %vm1417_vm12 = vcmp.gt.f32.partialorder %v1399_v36, 0.0 }
 0x32b   :  { %v1438_v19 = vmul.f32 %v1645_v37, %v1406_v49  ;;  %v1648_v7 = vsel %vm1417_vm12, 1.0, %v3105_v54  ;;  %v1649_v37 = vsel %vm1418_vm13, 1.0, %v3105_v54 }
 0x32d   :  { %v1464_v18 = vsel %vm1017_vm1, %v1438_v19, 0.0 }
 0x32e   :  { %v1465_v16 = vrot.slane %v1464_v18, 4 }
 0x330   :  { %v1466_v33 = vadd.f32 %v1465_v16, %v1464_v18 }
 0x332   :  { %v1467_v61 = vrot.slane %v1466_v33, 2 }
 0x334   :  { %v1774_v41 = vpop.f32.mrf.mxu0 }
 0x336   :  { %v1775_v17 = vpop.f32.mrf.mxu0 }
 0x337   :  { %v1776_v30 = vadd.f32 %v1775_v17, %v1774_v41 }
 0x339   :  { %v1338_v39 = vadd.f32 %v1776_v30, %v3106_v25  ;;  %v1453_v30 = vrot.slane %v1452_v45, 2 }
 0x33a   :  { %v1777_v34 = vpop.f32.mrf.mxu1 }
 0x33b   :  { %v1350_v13 = vadd.f32 %v3056_v53, %v1338_v39  ;;  %v1460_v39 = vrot.slane %v1459_v63, 2  ;;  %v1454_v49 = vadd.f32 %v1453_v30, %v1452_v45 }
 0x33c   :  { %v1778_v52 = vpop.f32.mrf.mxu1 }
 0x33d   :  { %v1779_v26 = vadd.f32 %v1778_v52, %v1777_v34  ;;  %v1407_v38 = vmax.f32 %v1350_v13, 0.0  ;;  %v1447_v13 = vadd.f32 %v1446_v62, %v1445_v32  ;;  %v1461_v52 = vadd.f32 %v1460_v39, %v1459_v63 }
 0x33e   :  { %v1780_v20 = vpop.f32.mrf.mxu1  ;;  %v1455_v0 = vrot.slane %v1454_v49, 1 }
 0x33f   :  { %v1339_v21 = vadd.f32 %v3107_v31, %v1779_v26  ;;  %v1439_v48 = vmul.f32 %v1646_v51, %v1407_v38  ;;  %v1468_v26 = vadd.f32 %v1467_v61, %v1466_v33  ;;  %v1462_v31 = vrot.slane %v1461_v52, 1 }
 0x340   :  { %v1781_v47 = vpop.f32.mrf.mxu1  ;;  %v1456_v55 = vadd.f32 %v1455_v0, %v1454_v49 }
 0x341   :  { %v1351_v43 = vadd.f32 %v3056_v53, %v1339_v21  ;;  %v1782_v46 = vadd.f32 %v1781_v47, %v1780_v20  ;;  %v1471_v8 = vsel %vm1017_vm1, %v1439_v48, 0.0  ;;  %v1448_v20 = vrot.slane %v1447_v13, 1 }
 0x342   :  { %v1472_v2 = vrot.slane %v1471_v8, 4  ;;  %v1469_v47 = vrot.slane %v1468_v26, 1 }
 0x343   :  { %v1340_v22 = vadd.f32 %v1782_v46, %v3108_v12  ;;  %v1408_v35 = vmax.f32 %v1351_v43, 0.0  ;;  %v1449_v42 = vadd.f32 %v1448_v20, %v1447_v13  ;;  %v1463_v46 = vadd.f32 %v1462_v31, %v1461_v52 }
 0x344   :  { %v1473_v17 = vadd.f32 %v1472_v2, %v1471_v8 }
 0x345   :  { %v1440_v24 = vmul.f32 %v1647_v4, %v1408_v35  ;;  %v1352_v27 = vadd.f32 %v3056_v53, %v1340_v22  ;;  %v1470_v4 = vadd.f32 %v1469_v47, %v1468_v26  ;;  %v1517_v22 = vsel %vm1516_vm14, %v1456_v55, %v1449_v42 }
 0x346   :  { %v1474_v6 = vrot.slane %v1473_v17, 2  ;;  %v1519_v10 = vsel %vm1518_vm15, %v1463_v46, %v1517_v22 }
 0x347   :  { %v1478_v23 = vsel %vm1017_vm1, %v1440_v24, 0.0  ;;  %v1409_v57 = vmax.f32 %v1352_v27, 0.0  ;;  %v1521_v1 = vsel %vm1520_vm0, %v1470_v4, %v1519_v10 }
 0x348   :  { %v1479_v9 = vrot.slane %v1478_v23, 4  ;;  %v1783_v3 = vpop.f32.mrf.mxu1  ;;  %v1475_v38 = vadd.f32 %v1474_v6, %v1473_v17 }
 0x349   :  { %v1441_v41 = vmul.f32 %v1648_v7, %v1409_v57  ;;  %v1650_v57 = vld [vmem:[%s3097_s4 + $0x20] ss:$0 sm:$0xff] }
 0x34a   :  { %v1784_v59 = vpop.f32.mrf.mxu1  ;;  %v1480_v56 = vadd.f32 %v1479_v9, %v1478_v23  ;;  %v1476_v36 = vrot.slane %v1475_v38, 1 }
 0x34b   :  { %v1485_v15 = vsel %vm1017_vm1, %v1441_v41, 0.0  ;;  %v1785_v58 = vadd.f32 %v1784_v59, %v1783_v3 }
 0x34c   :  { %v1486_v25 = vrot.slane %v1485_v15, 4  ;;  %v1481_v60 = vrot.slane %v1480_v56, 2  ;;  %v1477_v12 = vadd.f32 %v1476_v36, %v1475_v38 }
 0x34d   :  { %v1341_v5 = vadd.f32 %v3109_v28, %v1785_v58 }
 0x34e   :  { %v1487_v34 = vadd.f32 %v1486_v25, %v1485_v15  ;;  %v1482_v19 = vadd.f32 %v1481_v60, %v1480_v56  ;;  %v1523_v27 = vsel %vm1522_vm2, %v1477_v12, %v1521_v1 }
 0x34f   :  { %v1353_v44 = vadd.f32 %v3056_v53, %v1341_v5 }
 0x350   :  { %v1488_v29 = vrot.slane %v1487_v34, 2  ;;  %v1483_v43 = vrot.slane %v1482_v19, 1 }
 0x351   :  { %v1410_v11 = vmax.f32 %v1353_v44, 0.0 }
 0x352   :  { %v1489_v21 = vadd.f32 %v1488_v29, %v1487_v34  ;;  %v1484_v35 = vadd.f32 %v1483_v43, %v1482_v19 }
 0x353   :  { %v1442_v51 = vmul.f32 %v1649_v37, %v1410_v11 }
 0x354   :  { %v1490_v40 = vrot.slane %v1489_v21, 1  ;;  %v1525_v7 = vsel %vm1524_vm3, %v1484_v35, %v1523_v27 }
 0x355   :  { %v1492_v48 = vsel %vm1017_vm1, %v1442_v51, 0.0 }
 0x356   :  { %v1493_v53 = vrot.slane %v1492_v48, 4  ;;  %v1491_v8 = vadd.f32 %v1490_v40, %v1489_v21 }
 0x358   :  { %v1494_v54 = vadd.f32 %v1493_v53, %v1492_v48  ;;  %v1527_v2 = vsel %vm1526_vm4, %v1491_v8, %v1525_v7 }
 0x35a   :  { %v1495_v18 = vrot.slane %v1494_v54, 2 }
 0x35c   :  { %v1496_v14 = vadd.f32 %v1495_v18, %v1494_v54 }
 0x35e   :  { %v1497_v24 = vrot.slane %v1496_v14, 1 }
 0x360   :  { %v1498_v16 = vadd.f32 %v1497_v24, %v1496_v14 }
 0x362   :  { %v1529_v23 = vsel %vm1528_vm5, %v1498_v16, %v1527_v2 }
 0x363   :  { %1840 = vmatmul.mubr.msk.f32.vlgmr.msra.gmra.mxu1 %vm1017_vm1, %v1529_v23 }
 0x423   :  { %v1598_v45 = vpop.f32.mrf.mxu1 }
 0x424   :  { %v1599_v32 = vadd.f32 %v1650_v57, %v1598_v45 }
 0x425   :  { %v1841_v9 = vpop.f32.mrf.mxu1 }
 0x426   :  { %1602 = vst [vmem:[#allocation2] sm:$0xff] %v1599_v32 }
 0x427   :  { %1900 = shalt.err (!%p1897_p4)
}
 0x428   :  { %1612 = dma.vmem_to_hbm [thread:$0]  %s1610_s22, 128, %s3098_s5, [#allocation3]  }
 0x429   :  { %1909 = dma.done.wait [#allocation3], 128  }
 0x42a   :  { %1910 = vsyncadd [#allocation3], 4294967168 }
 0x42b   :  { %1616 = vsyncpa [#allocation3], 1 }

</bundles_post_ra>
